<compile_context>
chip_gen: v5e
topology: v5e:2x2
jax: 0.10.0
libtpu: 0.0.40
codegen_flags: <defaults>
</compile_context>

<pallas_src>
import functools

import jax
import jax.numpy as jnp
from jax.experimental import pallas as pl
from jax.experimental.pallas import tpu as pltpu

LANE = 128              # vreg lane width (last-dim alignment)
SUBLANE = 8             # f32 sublane count (second-to-last-dim alignment)
STREAM_TILE = 512       # tile width used for the two streamed (big) layers
STREAM_ALIGN = STREAM_TILE  # streamed feature dims padded to a tile multiple


def _round_up(x, m):
    return ((x + m - 1) // m) * m


def _softplus_f32(y):
    # PyTorch Softplus(beta=1, threshold=20): log(1 + exp(x)), linear for x > 20.
    return jnp.where(y > 20.0, y, jnp.log1p(jnp.exp(jnp.minimum(y, 20.0))))


# ----------------------------------------------------------------------------
# Fused kernel: layer 0 K-streamed, mid layers resident, last layer N-streamed.
# ----------------------------------------------------------------------------
def _make_kernel(num_mid, softplus_flags, bias_slices, b_pad, h0_pad, hl_pad,
                 tk, k_steps, tn, n_steps):
    num_layers = num_mid + 2

    def kernel(*refs):
        x_hbm, w_first_hbm, w_last_hbm, b_last_hbm, bias_slab = refs[:5]
        mid_w = refs[5:5 + num_mid]
        o_hbm = refs[5 + num_mid]
        acc0 = refs[6 + num_mid]

        # ---- layer 0: x @ W0, K-streamed from HBM, f32 accumulation ---------
        acc0[...] = jnp.zeros_like(acc0)

        def l0_step(x_tile, w_tile):
            acc0[...] += jnp.dot(x_tile[...].astype(jnp.float32),
                                 w_tile[...].astype(jnp.float32),
                                 preferred_element_type=jnp.float32)

        pltpu.emit_pipeline(
            l0_step,
            grid=(k_steps,),
            in_specs=[pl.BlockSpec((b_pad, tk), lambda k: (0, k)),
                      pl.BlockSpec((tk, h0_pad), lambda k: (k, 0))],
        )(x_hbm, w_first_hbm)

        off, width = bias_slices[0]
        h = acc0[...] + bias_slab[:, off:off + width].astype(jnp.float32)
        if softplus_flags[0]:
            h = _softplus_f32(h)

        # ---- mid layers: resident weights, f32 activations in vregs ---------
        for li in range(1, num_layers - 1):
            w = mid_w[li - 1][...].astype(jnp.float32)
            off, width = bias_slices[li]
            b = bias_slab[:, off:off + width].astype(jnp.float32)
            y = jnp.dot(h, w, preferred_element_type=jnp.float32) + b
            h = _softplus_f32(y) if softplus_flags[li] else y

        # ---- last layer: h @ W_last + b_last, N-streamed, write to HBM ------
        last_softplus = softplus_flags[num_layers - 1]

        def last_step(w_tile, b_tile, o_tile):
            y = jnp.dot(h, w_tile[...].astype(jnp.float32),
                        preferred_element_type=jnp.float32)
            y = y + b_tile[...].astype(jnp.float32)
            if last_softplus:
                y = _softplus_f32(y)
            o_tile[...] = y.astype(o_tile.dtype)

        pltpu.emit_pipeline(
            last_step,
            grid=(n_steps,),
            in_specs=[pl.BlockSpec((hl_pad, tn), lambda n: (0, n)),
                      pl.BlockSpec((1, tn), lambda n: (0, n))],
            out_specs=[pl.BlockSpec((b_pad, tn), lambda n: (0, n))],
        )(w_last_hbm, b_last_hbm, o_hbm)

    return kernel


# ----------------------------------------------------------------------------
# One-time parameter preparation (transpose, pad, cast) - outside the hot path.
# ----------------------------------------------------------------------------
def prepare_params(enc_layers, dec_layers, param_dtype=jnp.bfloat16):
    """Returns (params dict, softplus_flags).

    Weight storage defaults to bf16 (HBM-bandwidth-bound kernel); biases are
    kept in f32 (negligible bytes).  All weights pre-transposed to [Fin, Fout].
    """
    layers = list(enc_layers) + list(dec_layers)
    n_layers = len(layers)
    n_enc = len(enc_layers)
    assert n_layers >= 3, "need at least one resident mid layer"

    flags = tuple(not (i == n_enc - 1 or i == n_layers - 1)
                  for i in range(n_layers))

    # First (K-streamed) layer.
    w0, _ = layers[0]
    h0, f0 = w0.shape                                   # torch layout [out, in]
    f0_pad = _round_up(f0, STREAM_ALIGN)
    h0_pad = _round_up(h0, LANE)
    w_first = (jnp.zeros((f0_pad, h0_pad), param_dtype)
               .at[:f0, :h0].set(w0.T.astype(param_dtype)))

    # Last (N-streamed) layer.
    wl, bl = layers[-1]
    fl, hl = wl.shape
    fl_pad = _round_up(fl, STREAM_ALIGN)
    hl_pad = _round_up(hl, LANE)
    w_last = (jnp.zeros((hl_pad, fl_pad), param_dtype)
              .at[:hl, :fl].set(wl.T.astype(param_dtype)))
    b_last = (jnp.zeros((1, fl_pad), jnp.float32)
              .at[0, :fl].set(bl.astype(jnp.float32)))

    # Mid layers (fully resident).
    mid_ws = []
    for i in range(1, n_layers - 1):
        w, _ = layers[i]
        fout, fin = w.shape
        fin_p, fout_p = _round_up(fin, LANE), _round_up(fout, LANE)
        mid_ws.append(jnp.zeros((fin_p, fout_p), param_dtype)
                      .at[:fin, :fout].set(w.T.astype(param_dtype)))

    # Single bias slab for layers 0..n-2 (one DMA instead of many tiny ones).
    widths = [h0_pad] + [w.shape[1] for w in mid_ws]
    slab = jnp.zeros((1, sum(widths)), jnp.float32)
    off = 0
    for i in range(n_layers - 1):
        _, b = layers[i]
        slab = slab.at[0, off:off + b.shape[0]].set(b.astype(jnp.float32))
        off += widths[i]

    params = dict(w_first=w_first, w_last=w_last, b_last=b_last,
                  bias_slab=slab, mid_ws=tuple(mid_ws))
    return params, flags


# ----------------------------------------------------------------------------
# Fused forward pass (single pallas_call).
# ----------------------------------------------------------------------------
@functools.partial(jax.jit, static_argnames=("softplus_flags", "out_features"))
def autoencoder_forward(x, params, softplus_flags, out_features):
    w_first = params["w_first"]
    w_last = params["w_last"]
    b_last = params["b_last"]
    bias_slab = params["bias_slab"]
    mid_ws = tuple(params["mid_ws"])
    num_mid = len(mid_ws)
    num_layers = num_mid + 2
    assert len(softplus_flags) == num_layers

    B, fin = x.shape
    f0_pad, h0_pad = w_first.shape
    hl_pad, fl_pad = w_last.shape
    b_pad = _round_up(max(B, SUBLANE), SUBLANE)

    tk = min(STREAM_TILE, f0_pad)
    tn = min(STREAM_TILE, fl_pad)
    assert f0_pad % tk == 0 and fl_pad % tn == 0
    k_steps = f0_pad // tk
    n_steps = fl_pad // tn

    # Static bias-slab slices (all 128-aligned -> free views in VMEM).
    widths = [h0_pad] + [w.shape[1] for w in mid_ws]
    offs, o = [], 0
    for w_ in widths:
        offs.append(o)
        o += w_
    bias_slices = tuple((offs[i], widths[i]) for i in range(num_layers - 1))

    # Zero-pad the input (exact: padded weight rows/cols are zero).
    x_pad = jnp.zeros((b_pad, f0_pad), x.dtype).at[:B, :fin].set(x)

    flat_inputs = [x_pad, w_first, w_last, b_last, bias_slab, *mid_ws]
    in_specs = [
        pl.BlockSpec(memory_space=pl.ANY),               # x        (K-streamed)
        pl.BlockSpec(memory_space=pl.ANY),               # W_first  (K-streamed)
        pl.BlockSpec(memory_space=pl.ANY),               # W_last   (N-streamed)
        pl.BlockSpec(memory_space=pl.ANY),               # b_last   (N-streamed)
        pl.BlockSpec(bias_slab.shape, lambda: (0, 0)),   # bias slab (resident)
    ]
    for w in mid_ws:                                     # small resident weights
        in_specs.append(pl.BlockSpec(w.shape, lambda: (0, 0)))

    # Scoped-VMEM budget: resident params (x2 for default double-buffering of
    # the tiny top-level specs) + activations + streamed tile double-buffers,
    # clamped to the chip's physical VMEM minus headroom.
    def _isz(a):
        return jnp.dtype(a.dtype).itemsize

    resident = sum(int(a.size) * _isz(a) for a in [bias_slab, *mid_ws])
    acc_bytes = b_pad * h0_pad * 4
    act_bytes = 2 * b_pad * max(h0_pad, hl_pad) * 4
    stream = (2 * (b_pad * tk * _isz(x_pad) + tk * h0_pad * _isz(w_first))
              + 2 * (hl_pad * tn * _isz(w_last) + tn * 4
                     + b_pad * tn * _isz(x_pad)))
    needed = 2 * resident + acc_bytes + act_bytes + stream
    try:
        vmem_cap = int(pltpu.get_tpu_info().vmem_capacity_bytes)
    except Exception:
        vmem_cap = 64 << 20          # conservative: v7x per-TensorCore VMEM
    vmem_limit = max(32 << 20,
                     min(int(1.2 * needed) + (4 << 20), vmem_cap - (4 << 20)))

    kernel = _make_kernel(num_mid, softplus_flags, bias_slices, b_pad,
                          h0_pad, hl_pad, tk, k_steps, tn, n_steps)

    out = pl.pallas_call(
        kernel,
        out_shape=jax.ShapeDtypeStruct((b_pad, fl_pad), x.dtype),
        in_specs=in_specs,
        out_specs=pl.BlockSpec(memory_space=pl.ANY),
        scratch_shapes=[pltpu.VMEM((b_pad, h0_pad), jnp.float32)],
        compiler_params=pltpu.CompilerParams(vmem_limit_bytes=vmem_limit),
    )(*flat_inputs)
    return out[:B, :out_features]


# ----------------------------------------------------------------------------
# Parameter construction (deterministic, mimics nn.Linear's U(-1/sqrt(in), +))
# ----------------------------------------------------------------------------
def init_linear(key, in_features, out_features, dtype=jnp.float32):
    kw, kb = jax.random.split(key)
    bound = 1.0 / jnp.sqrt(jnp.asarray(in_features, dtype))
    w = jax.random.uniform(kw, (out_features, in_features), dtype, -bound, bound)
    b = jax.random.uniform(kb, (out_features,), dtype, -bound, bound)
    return w, b


def init_autoencoder_params(key, space_dim, hidden_units, n_z):
    """Returns (encoder_layers, decoder_layers) as lists of (W, b) in PyTorch layout."""
    enc_dims = [space_dim] + list(hidden_units) + [n_z]
    dec_dims = [n_z] + list(hidden_units[::-1]) + [space_dim]
    enc, dec = [], []
    for din, dout in zip(enc_dims[:-1], enc_dims[1:]):
        key, sub = jax.random.split(key)
        enc.append(init_linear(sub, din, dout))
    for din, dout in zip(dec_dims[:-1], dec_dims[1:]):
        key, sub = jax.random.split(key)
        dec.append(init_linear(sub, din, dout))
    return enc, dec


# Pure-JAX reference for correctness checking.
def _reference_forward(x, enc_layers, dec_layers):
    for w, b in enc_layers[:-1]:
        x = _softplus_f32(x @ w.T + b)
    w, b = enc_layers[-1]
    x = x @ w.T + b
    for w, b in dec_layers[:-1]:
        x = _softplus_f32(x @ w.T + b)
    w, b = dec_layers[-1]
    return x @ w.T + b


if __name__ == "__main__":
    # Small shapes consistent with the module structure
    # (original: space_dim=10100, hidden=[1000,200,50,20], n_z=5).
    batch = 2
    space_dim = 512
    hidden_units = [256, 128, 64, 32]
    n_z = 8

    key = jax.random.PRNGKey(0)
    key_params, key_x = jax.random.split(key)

    enc_layers, dec_layers = init_autoencoder_params(
        key_params, space_dim, hidden_units, n_z
    )
    x = jax.random.normal(key_x, (batch, space_dim), dtype=jnp.float32)
    ref = _reference_forward(x, enc_layers, dec_layers)

    # --- default path: bf16 weight storage, f32 activations/accumulation ----
    params_bf16, flags = prepare_params(enc_layers, dec_layers, jnp.bfloat16)
    out = jax.block_until_ready(
        autoencoder_forward(x, params_bf16, flags, space_dim)
    )
    assert out.shape == (batch, space_dim), out.shape
    assert bool(jnp.isfinite(out).all()), "bf16-weight output not finite"
    assert jnp.allclose(out, ref, atol=5e-2, rtol=5e-2), "bf16-weight mismatch vs reference"

    # --- f32 weights (numerically tight check of the same streamed path) ----
    params_f32, flags = prepare_params(enc_layers, dec_layers, jnp.float32)
    out_f32 = jax.block_until_ready(
        autoencoder_forward(x, params_f32, flags, space_dim)
    )
    assert out_f32.shape == (batch, space_dim), out_f32.shape
    assert jnp.allclose(out_f32, ref, atol=1e-3, rtol=1e-3), "f32 mismatch vs reference"

    print("KERNEL_OK")
</pallas_src>

<mosaic_0001>
module attributes {stable_mosaic.version = 11 : i64} {
  func.func @kernel(%arg0: memref<8x512xf32, #tpu.memory_space<any>>, %arg1: memref<512x256xbf16, #tpu.memory_space<any>>, %arg2: memref<256x512xbf16, #tpu.memory_space<any>>, %arg3: memref<1x512xf32, #tpu.memory_space<any>>, %arg4: memref<1x1408xf32, #tpu.memory_space<vmem>>, %arg5: memref<256x128xbf16, #tpu.memory_space<vmem>>, %arg6: memref<128x128xbf16, #tpu.memory_space<vmem>>, %arg7: memref<128x128xbf16, #tpu.memory_space<vmem>>, %arg8: memref<128x128xbf16, #tpu.memory_space<vmem>>, %arg9: memref<128x128xbf16, #tpu.memory_space<vmem>>, %arg10: memref<128x128xbf16, #tpu.memory_space<vmem>>, %arg11: memref<128x128xbf16, #tpu.memory_space<vmem>>, %arg12: memref<128x256xbf16, #tpu.memory_space<vmem>>, %arg13: memref<8x512xf32, #tpu.memory_space<any>>, %arg14: memref<8x256xf32, #tpu.memory_space<vmem>>) attributes {dimension_semantics = [], scalar_prefetch = 0 : i64, scratch_operands = 1 : i64, tpu.core_type = #tpu.core_type<tc>} {
    %cst = arith.constant 0.000000e+00 : f32
    %0 = vector.broadcast %cst : f32 to vector<8x256xf32>
    %c0 = arith.constant 0 : index
    %c0_0 = arith.constant 0 : index
    %1 = vector.load %arg14[%c0, %c0_0] : memref<8x256xf32, #tpu.memory_space<vmem>>, vector<8x256xf32>
    tpu.vector_store %arg14[%c0, %c0_0], %0 {strides = array<i32>} : memref<8x256xf32, #tpu.memory_space<vmem>>, vector<8x256xf32>,
    %c1_i32 = arith.constant 1 : i32
    %c1_i32_1 = arith.constant 1 : i32
    %2 = arith.muli %c1_i32, %c1_i32_1 : i32
    "tpu.region"() ({
      %alloca = memref.alloca() : memref<8x512xf32, #tpu.memory_space<vmem>>
      %alloca_56 = memref.alloca() : memref<512x256xbf16, #tpu.memory_space<vmem>>
      %c0_i32 = arith.constant 0 : i32
      %112 = arith.cmpi sgt, %2, %c0_i32 : i32
      %113 = arith.extui %112 : i1 to i32
      %c0_i32_57 = arith.constant 0 : i32
      %114 = arith.cmpi ne, %113, %c0_i32_57 : i32
      scf.if %114 {
        %c1_i32_58 = arith.constant 1 : i32
        %c1_i32_59 = arith.constant 1 : i32
        %115 = arith.muli %c1_i32_58, %c1_i32_59 : i32
        %c1_i32_60 = arith.constant 1 : i32
        %116 = arith.subi %115, %c1_i32_60 : i32
        %c0_i32_61 = arith.constant 0 : i32
        %117 = arith.cmpi eq, %116, %c0_i32_61 : i32
        %true = arith.constant true
        %c0_i32_62 = arith.constant 0 : i32
        %c-1_i32 = arith.constant -1 : i32
        %118 = arith.select %true, %c-1_i32, %c0_i32_62 : i32
        %c-1_i32_63 = arith.constant -1 : i32
        %119 = arith.cmpi eq, %118, %c-1_i32_63 : i32
        %c0_i32_64 = arith.constant 0 : i32
        %120 = arith.select %119, %c0_i32_64, %118 : i32
        %true_65 = arith.constant true
        %c0_i32_66 = arith.constant 0 : i32
        %c1_i32_67 = arith.constant 1 : i32
        %121 = arith.select %true_65, %c1_i32_67, %c0_i32_66 : i32
        %c1_i32_68 = arith.constant 1 : i32
        %122 = arith.cmpi eq, %121, %c1_i32_68 : i32
        %c0_i32_69 = arith.constant 0 : i32
        %123 = arith.select %122, %c0_i32_69, %121 : i32
        %true_70 = arith.constant true
        %c0_i32_71 = arith.constant 0 : i32
        %c1_i32_72 = arith.constant 1 : i32
        %124 = arith.select %true_70, %c1_i32_72, %c0_i32_71 : i32
        %c1_i32_73 = arith.constant 1 : i32
        %125 = arith.cmpi eq, %124, %c1_i32_73 : i32
        %c0_i32_74 = arith.constant 0 : i32
        %126 = arith.select %125, %c0_i32_74, %124 : i32
        "tpu.region"() ({
          %148 = tpu.sem_alloc : memref<!tpu.dma_semaphore, #tpu.memory_space<semaphore_mem>>
          tpu.enqueue_dma source(%arg0 : memref<8x512xf32, #tpu.memory_space<any>>) target(%alloca : memref<8x512xf32, #tpu.memory_space<vmem>>) target_semaphore(%148 : memref<!tpu.dma_semaphore, #tpu.memory_space<semaphore_mem>>)
          tpu.wait_dma2 semaphore(%148 : memref<!tpu.dma_semaphore, #tpu.memory_space<semaphore_mem>>) src(%arg0 : memref<8x512xf32, #tpu.memory_space<any>>) dst(%alloca : memref<8x512xf32, #tpu.memory_space<vmem>>)
          tpu.yield
        }) : () -> ()
        "tpu.region"() ({
          %148 = tpu.sem_alloc : memref<!tpu.dma_semaphore, #tpu.memory_space<semaphore_mem>>
          tpu.enqueue_dma source(%arg1 : memref<512x256xbf16, #tpu.memory_space<any>>) target(%alloca_56 : memref<512x256xbf16, #tpu.memory_space<vmem>>) target_semaphore(%148 : memref<!tpu.dma_semaphore, #tpu.memory_space<semaphore_mem>>)
          tpu.wait_dma2 semaphore(%148 : memref<!tpu.dma_semaphore, #tpu.memory_space<semaphore_mem>>) src(%arg1 : memref<512x256xbf16, #tpu.memory_space<any>>) dst(%alloca_56 : memref<512x256xbf16, #tpu.memory_space<vmem>>)
          tpu.yield
        }) : () -> ()
        %c0_i32_75 = arith.constant 0 : i32
        %c0_i32_76 = arith.constant 0 : i32
        %c0_i32_77 = arith.constant 0 : i32
        %c0_i32_78 = arith.constant 0 : i32
        %c0_i32_79 = arith.constant 0 : i32
        %c0_i32_80 = arith.constant 0 : i32
        %127 = arith.subi %2, %c0_i32_77 : i32
        %128 = arith.addi %c0_i32_77, %127 : i32
        %c1_i32_81 = arith.constant 1 : i32
        %129:3 = scf.for %arg15 = %c0_i32_77 to %128 step %c1_i32_81 iter_args(%arg16 = %c0_i32_78, %arg17 = %c0_i32_79, %arg18 = %c0_i32_80) -> (i32, i32, i32)  : i32 {
          %c1_i32_106 = arith.constant 1 : i32
          %c1_i32_107 = arith.constant 1 : i32
          %148 = arith.muli %c1_i32_106, %c1_i32_107 : i32
          %c0_i32_108 = arith.constant 0 : i32
          %149 = arith.cmpi eq, %arg15, %c0_i32_108 : i32
          %c1_i32_109 = arith.constant 1 : i32
          %150 = arith.subi %148, %c1_i32_109 : i32
          %151 = arith.cmpi eq, %arg15, %150 : i32
          %true_110 = arith.constant true
          %c0_i32_111 = arith.constant 0 : i32
          %c-1_i32_112 = arith.constant -1 : i32
          %152 = arith.select %true_110, %c-1_i32_112, %c0_i32_111 : i32
          %c-1_i32_113 = arith.constant -1 : i32
          %153 = arith.cmpi eq, %152, %c-1_i32_113 : i32
          %c0_i32_114 = arith.constant 0 : i32
          %154 = arith.select %153, %c0_i32_114, %152 : i32
          %true_115 = arith.constant true
          %c0_i32_116 = arith.constant 0 : i32
          %c1_i32_117 = arith.constant 1 : i32
          %155 = arith.select %true_115, %c1_i32_117, %c0_i32_116 : i32
          %c1_i32_118 = arith.constant 1 : i32
          %156 = arith.cmpi eq, %155, %c1_i32_118 : i32
          %c0_i32_119 = arith.constant 0 : i32
          %157 = arith.select %156, %c0_i32_119, %155 : i32
          %true_120 = arith.constant true
          %c0_i32_121 = arith.constant 0 : i32
          %c1_i32_122 = arith.constant 1 : i32
          %158 = arith.select %true_120, %c1_i32_122, %c0_i32_121 : i32
          %c1_i32_123 = arith.constant 1 : i32
          %159 = arith.cmpi eq, %158, %c1_i32_123 : i32
          %c0_i32_124 = arith.constant 0 : i32
          %160 = arith.select %159, %c0_i32_124, %158 : i32
          "tpu.trace_start"() <{level = 10 : i32, message = "ep_run_kernel"}> : () -> ()
          %c0_125 = arith.constant 0 : index
          %c0_126 = arith.constant 0 : index
          %161 = vector.load %arg14[%c0_125, %c0_126] : memref<8x256xf32, #tpu.memory_space<vmem>>, vector<8x256xf32>
          %c0_127 = arith.constant 0 : index
          %c0_128 = arith.constant 0 : index
          %162 = vector.load %alloca[%c0_127, %c0_128] : memref<8x512xf32, #tpu.memory_space<vmem>>, vector<8x512xf32>
          %c0_129 = arith.constant 0 : index
          %c0_130 = arith.constant 0 : index
          %163 = vector.load %alloca_56[%c0_129, %c0_130] : memref<512x256xbf16, #tpu.memory_space<vmem>>, vector<512x256xbf16>
          %164 = arith.extf %163 : vector<512x256xbf16> to vector<512x256xf32>
          %cst_131 = arith.constant dense<0.000000e+00> : vector<8x256xf32>
          %165 = tpu.matmul %162, %164, %cst_131 {dimension_numbers = #tpu.dot_dimension_numbers<[1], [0], [0], [1], [0, 0, 1, 1], [], []>} : vector<8x512xf32>, vector<512x256xf32>, vector<8x256xf32> -> vector<8x256xf32>
          %166 = arith.addf %161, %165 : vector<8x256xf32>
          %c0_132 = arith.constant 0 : index
          %c0_133 = arith.constant 0 : index
          %167 = vector.load %arg14[%c0_132, %c0_133] : memref<8x256xf32, #tpu.memory_space<vmem>>, vector<8x256xf32>
          tpu.vector_store %arg14[%c0_132, %c0_133], %166 {strides = array<i32>} : memref<8x256xf32, #tpu.memory_space<vmem>>, vector<8x256xf32>,
          "tpu.trace_stop"() : () -> ()
          %false = arith.constant false
          %168 = arith.ori %false, %151 : i1
          %c1_i32_134 = arith.constant 1 : i32
          %169 = arith.addi %arg16, %c1_i32_134 : i32
          %170 = arith.select %168, %169, %arg16 : i32
          %false_135 = arith.constant false
          %171 = arith.ori %false_135, %151 : i1
          %c1_i32_136 = arith.constant 1 : i32
          %172 = arith.addi %arg17, %c1_i32_136 : i32
          %173 = arith.select %171, %172, %arg17 : i32
          %true_137 = arith.constant true
          %c0_i32_138 = arith.constant 0 : i32
          %c1_i32_139 = arith.constant 1 : i32
          %174 = arith.select %true_137, %c1_i32_139, %c0_i32_138 : i32
          %c1_i32_140 = arith.constant 1 : i32
          %175 = arith.cmpi eq, %174, %c1_i32_140 : i32
          %c0_i32_141 = arith.constant 0 : i32
          %176 = arith.select %175, %c0_i32_141, %174 : i32
          %c0_i32_142 = arith.constant 0 : i32
          scf.yield %170, %173, %c0_i32_142 : i32, i32, i32
        }
        %c1_i32_82 = arith.constant 1 : i32
        %130 = arith.subi %129#2, %c1_i32_82 : i32
        %true_83 = arith.constant true
        %131 = arith.select %true_83, %130, %129#2 : i32
        %c-1_i32_84 = arith.constant -1 : i32
        %132 = arith.cmpi eq, %131, %c-1_i32_84 : i32
        %c0_i32_85 = arith.constant 0 : i32
        %133 = arith.select %132, %c0_i32_85, %131 : i32
        %c1_i32_86 = arith.constant 1 : i32
        %134 = arith.subi %2, %c1_i32_86 : i32
        %c1_i32_87 = arith.constant 1 : i32
        %c1_i32_88 = arith.constant 1 : i32
        %135 = arith.muli %c1_i32_87, %c1_i32_88 : i32
        %c0_i32_89 = arith.constant 0 : i32
        %136 = arith.cmpi eq, %134, %c0_i32_89 : i32
        %c1_i32_90 = arith.constant 1 : i32
        %137 = arith.subi %135, %c1_i32_90 : i32
        %138 = arith.cmpi eq, %134, %137 : i32
        %true_91 = arith.constant true
        %c0_i32_92 = arith.constant 0 : i32
        %c-1_i32_93 = arith.constant -1 : i32
        %139 = arith.select %true_91, %c-1_i32_93, %c0_i32_92 : i32
        %c-1_i32_94 = arith.constant -1 : i32
        %140 = arith.cmpi eq, %139, %c-1_i32_94 : i32
        %c0_i32_95 = arith.constant 0 : i32
        %141 = arith.select %140, %c0_i32_95, %139 : i32
        %true_96 = arith.constant true
        %c0_i32_97 = arith.constant 0 : i32
        %c1_i32_98 = arith.constant 1 : i32
        %142 = arith.select %true_96, %c1_i32_98, %c0_i32_97 : i32
        %c1_i32_99 = arith.constant 1 : i32
        %143 = arith.cmpi eq, %142, %c1_i32_99 : i32
        %c0_i32_100 = arith.constant 0 : i32
        %144 = arith.select %143, %c0_i32_100, %142 : i32
        %true_101 = arith.constant true
        %c0_i32_102 = arith.constant 0 : i32
        %c1_i32_103 = arith.constant 1 : i32
        %145 = arith.select %true_101, %c1_i32_103, %c0_i32_102 : i32
        %c1_i32_104 = arith.constant 1 : i32
        %146 = arith.cmpi eq, %145, %c1_i32_104 : i32
        %c0_i32_105 = arith.constant 0 : i32
        %147 = arith.select %146, %c0_i32_105, %145 : i32
      } else {
      }
      tpu.yield
    }) : () -> ()
    %c0_2 = arith.constant 0 : index
    %c0_3 = arith.constant 0 : index
    %3 = vector.load %arg14[%c0_2, %c0_3] : memref<8x256xf32, #tpu.memory_space<vmem>>, vector<8x256xf32>
    %c0_4 = arith.constant 0 : index
    %c0_5 = arith.constant 0 : index
    %4 = vector.load %arg4[%c0_4, %c0_5] : memref<1x1408xf32, #tpu.memory_space<vmem>>, vector<1x256xf32>
    %5 = vector.broadcast %4 : vector<1x256xf32> to vector<8x256xf32>
    %6 = arith.addf %3, %5 : vector<8x256xf32>
    %cst_6 = arith.constant 2.000000e+01 : f32
    %7 = vector.broadcast %cst_6 : f32 to vector<8x256xf32>
    %8 = arith.cmpf ogt, %6, %7 : vector<8x256xf32>
    %cst_7 = arith.constant 2.000000e+01 : f32
    %9 = vector.broadcast %cst_7 : f32 to vector<8x256xf32>
    %10 = arith.minimumf %6, %9 : vector<8x256xf32>
    %11 = math.exp %10 : vector<8x256xf32>
    %12 = math.log1p %11 : vector<8x256xf32>
    %13 = arith.select %8, %6, %12 : vector<8x256xi1>, vector<8x256xf32>
    %c0_8 = arith.constant 0 : index
    %c0_9 = arith.constant 0 : index
    %14 = vector.load %arg5[%c0_8, %c0_9] : memref<256x128xbf16, #tpu.memory_space<vmem>>, vector<256x128xbf16>
    %15 = arith.extf %14 : vector<256x128xbf16> to vector<256x128xf32>
    %c0_10 = arith.constant 0 : index
    %c256 = arith.constant 256 : index
    %16 = vector.load %arg4[%c0_10, %c256] : memref<1x1408xf32, #tpu.memory_space<vmem>>, vector<1x128xf32>
    %cst_11 = arith.constant dense<0.000000e+00> : vector<8x128xf32>
    %17 = tpu.matmul %13, %15, %cst_11 {dimension_numbers = #tpu.dot_dimension_numbers<[1], [0], [0], [1], [0, 0, 1, 1], [], []>} : vector<8x256xf32>, vector<256x128xf32>, vector<8x128xf32> -> vector<8x128xf32>
    %18 = vector.broadcast %16 : vector<1x128xf32> to vector<8x128xf32>
    %19 = arith.addf %17, %18 : vector<8x128xf32>
    %cst_12 = arith.constant 2.000000e+01 : f32
    %20 = vector.broadcast %cst_12 : f32 to vector<8x128xf32>
    %21 = arith.cmpf ogt, %19, %20 : vector<8x128xf32>
    %cst_13 = arith.constant 2.000000e+01 : f32
    %22 = vector.broadcast %cst_13 : f32 to vector<8x128xf32>
    %23 = arith.minimumf %19, %22 : vector<8x128xf32>
    %24 = math.exp %23 : vector<8x128xf32>
    %25 = math.log1p %24 : vector<8x128xf32>
    %26 = arith.select %21, %19, %25 : vector<8x128xi1>, vector<8x128xf32>
    %c0_14 = arith.constant 0 : index
    %c0_15 = arith.constant 0 : index
    %27 = vector.load %arg6[%c0_14, %c0_15] : memref<128x128xbf16, #tpu.memory_space<vmem>>, vector<128x128xbf16>
    %28 = arith.extf %27 : vector<128x128xbf16> to vector<128x128xf32>
    %c0_16 = arith.constant 0 : index
    %c384 = arith.constant 384 : index
    %29 = vector.load %arg4[%c0_16, %c384] : memref<1x1408xf32, #tpu.memory_space<vmem>>, vector<1x128xf32>
    %cst_17 = arith.constant dense<0.000000e+00> : vector<8x128xf32>
    %30 = tpu.matmul %26, %28, %cst_17 {dimension_numbers = #tpu.dot_dimension_numbers<[1], [0], [0], [1], [0, 0, 1, 1], [], []>} : vector<8x128xf32>, vector<128x128xf32>, vector<8x128xf32> -> vector<8x128xf32>
    %31 = vector.broadcast %29 : vector<1x128xf32> to vector<8x128xf32>
    %32 = arith.addf %30, %31 : vector<8x128xf32>
    %cst_18 = arith.constant 2.000000e+01 : f32
    %33 = vector.broadcast %cst_18 : f32 to vector<8x128xf32>
    %34 = arith.cmpf ogt, %32, %33 : vector<8x128xf32>
    %cst_19 = arith.constant 2.000000e+01 : f32
    %35 = vector.broadcast %cst_19 : f32 to vector<8x128xf32>
    %36 = arith.minimumf %32, %35 : vector<8x128xf32>
    %37 = math.exp %36 : vector<8x128xf32>
    %38 = math.log1p %37 : vector<8x128xf32>
    %39 = arith.select %34, %32, %38 : vector<8x128xi1>, vector<8x128xf32>
    %c0_20 = arith.constant 0 : index
    %c0_21 = arith.constant 0 : index
    %40 = vector.load %arg7[%c0_20, %c0_21] : memref<128x128xbf16, #tpu.memory_space<vmem>>, vector<128x128xbf16>
    %41 = arith.extf %40 : vector<128x128xbf16> to vector<128x128xf32>
    %c0_22 = arith.constant 0 : index
    %c512 = arith.constant 512 : index
    %42 = vector.load %arg4[%c0_22, %c512] : memref<1x1408xf32, #tpu.memory_space<vmem>>, vector<1x128xf32>
    %cst_23 = arith.constant dense<0.000000e+00> : vector<8x128xf32>
    %43 = tpu.matmul %39, %41, %cst_23 {dimension_numbers = #tpu.dot_dimension_numbers<[1], [0], [0], [1], [0, 0, 1, 1], [], []>} : vector<8x128xf32>, vector<128x128xf32>, vector<8x128xf32> -> vector<8x128xf32>
    %44 = vector.broadcast %42 : vector<1x128xf32> to vector<8x128xf32>
    %45 = arith.addf %43, %44 : vector<8x128xf32>
    %cst_24 = arith.constant 2.000000e+01 : f32
    %46 = vector.broadcast %cst_24 : f32 to vector<8x128xf32>
    %47 = arith.cmpf ogt, %45, %46 : vector<8x128xf32>
    %cst_25 = arith.constant 2.000000e+01 : f32
    %48 = vector.broadcast %cst_25 : f32 to vector<8x128xf32>
    %49 = arith.minimumf %45, %48 : vector<8x128xf32>
    %50 = math.exp %49 : vector<8x128xf32>
    %51 = math.log1p %50 : vector<8x128xf32>
    %52 = arith.select %47, %45, %51 : vector<8x128xi1>, vector<8x128xf32>
    %c0_26 = arith.constant 0 : index
    %c0_27 = arith.constant 0 : index
    %53 = vector.load %arg8[%c0_26, %c0_27] : memref<128x128xbf16, #tpu.memory_space<vmem>>, vector<128x128xbf16>
    %54 = arith.extf %53 : vector<128x128xbf16> to vector<128x128xf32>
    %c0_28 = arith.constant 0 : index
    %c640 = arith.constant 640 : index
    %55 = vector.load %arg4[%c0_28, %c640] : memref<1x1408xf32, #tpu.memory_space<vmem>>, vector<1x128xf32>
    %cst_29 = arith.constant dense<0.000000e+00> : vector<8x128xf32>
    %56 = tpu.matmul %52, %54, %cst_29 {dimension_numbers = #tpu.dot_dimension_numbers<[1], [0], [0], [1], [0, 0, 1, 1], [], []>} : vector<8x128xf32>, vector<128x128xf32>, vector<8x128xf32> -> vector<8x128xf32>
    %57 = vector.broadcast %55 : vector<1x128xf32> to vector<8x128xf32>
    %58 = arith.addf %56, %57 : vector<8x128xf32>
    %c0_30 = arith.constant 0 : index
    %c0_31 = arith.constant 0 : index
    %59 = vector.load %arg9[%c0_30, %c0_31] : memref<128x128xbf16, #tpu.memory_space<vmem>>, vector<128x128xbf16>
    %60 = arith.extf %59 : vector<128x128xbf16> to vector<128x128xf32>
    %c0_32 = arith.constant 0 : index
    %c768 = arith.constant 768 : index
    %61 = vector.load %arg4[%c0_32, %c768] : memref<1x1408xf32, #tpu.memory_space<vmem>>, vector<1x128xf32>
    %cst_33 = arith.constant dense<0.000000e+00> : vector<8x128xf32>
    %62 = tpu.matmul %58, %60, %cst_33 {dimension_numbers = #tpu.dot_dimension_numbers<[1], [0], [0], [1], [0, 0, 1, 1], [], []>} : vector<8x128xf32>, vector<128x128xf32>, vector<8x128xf32> -> vector<8x128xf32>
    %63 = vector.broadcast %61 : vector<1x128xf32> to vector<8x128xf32>
    %64 = arith.addf %62, %63 : vector<8x128xf32>
    %cst_34 = arith.constant 2.000000e+01 : f32
    %65 = vector.broadcast %cst_34 : f32 to vector<8x128xf32>
    %66 = arith.cmpf ogt, %64, %65 : vector<8x128xf32>
    %cst_35 = arith.constant 2.000000e+01 : f32
    %67 = vector.broadcast %cst_35 : f32 to vector<8x128xf32>
    %68 = arith.minimumf %64, %67 : vector<8x128xf32>
    %69 = math.exp %68 : vector<8x128xf32>
    %70 = math.log1p %69 : vector<8x128xf32>
    %71 = arith.select %66, %64, %70 : vector<8x128xi1>, vector<8x128xf32>
    %c0_36 = arith.constant 0 : index
    %c0_37 = arith.constant 0 : index
    %72 = vector.load %arg10[%c0_36, %c0_37] : memref<128x128xbf16, #tpu.memory_space<vmem>>, vector<128x128xbf16>
    %73 = arith.extf %72 : vector<128x128xbf16> to vector<128x128xf32>
    %c0_38 = arith.constant 0 : index
    %c896 = arith.constant 896 : index
    %74 = vector.load %arg4[%c0_38, %c896] : memref<1x1408xf32, #tpu.memory_space<vmem>>, vector<1x128xf32>
    %cst_39 = arith.constant dense<0.000000e+00> : vector<8x128xf32>
    %75 = tpu.matmul %71, %73, %cst_39 {dimension_numbers = #tpu.dot_dimension_numbers<[1], [0], [0], [1], [0, 0, 1, 1], [], []>} : vector<8x128xf32>, vector<128x128xf32>, vector<8x128xf32> -> vector<8x128xf32>
    %76 = vector.broadcast %74 : vector<1x128xf32> to vector<8x128xf32>
    %77 = arith.addf %75, %76 : vector<8x128xf32>
    %cst_40 = arith.constant 2.000000e+01 : f32
    %78 = vector.broadcast %cst_40 : f32 to vector<8x128xf32>
    %79 = arith.cmpf ogt, %77, %78 : vector<8x128xf32>
    %cst_41 = arith.constant 2.000000e+01 : f32
    %80 = vector.broadcast %cst_41 : f32 to vector<8x128xf32>
    %81 = arith.minimumf %77, %80 : vector<8x128xf32>
    %82 = math.exp %81 : vector<8x128xf32>
    %83 = math.log1p %82 : vector<8x128xf32>
    %84 = arith.select %79, %77, %83 : vector<8x128xi1>, vector<8x128xf32>
    %c0_42 = arith.constant 0 : index
    %c0_43 = arith.constant 0 : index
    %85 = vector.load %arg11[%c0_42, %c0_43] : memref<128x128xbf16, #tpu.memory_space<vmem>>, vector<128x128xbf16>
    %86 = arith.extf %85 : vector<128x128xbf16> to vector<128x128xf32>
    %c0_44 = arith.constant 0 : index
    %c1024 = arith.constant 1024 : index
    %87 = vector.load %arg4[%c0_44, %c1024] : memref<1x1408xf32, #tpu.memory_space<vmem>>, vector<1x128xf32>
    %cst_45 = arith.constant dense<0.000000e+00> : vector<8x128xf32>
    %88 = tpu.matmul %84, %86, %cst_45 {dimension_numbers = #tpu.dot_dimension_numbers<[1], [0], [0], [1], [0, 0, 1, 1], [], []>} : vector<8x128xf32>, vector<128x128xf32>, vector<8x128xf32> -> vector<8x128xf32>
    %89 = vector.broadcast %87 : vector<1x128xf32> to vector<8x128xf32>
    %90 = arith.addf %88, %89 : vector<8x128xf32>
    %cst_46 = arith.constant 2.000000e+01 : f32
    %91 = vector.broadcast %cst_46 : f32 to vector<8x128xf32>
    %92 = arith.cmpf ogt, %90, %91 : vector<8x128xf32>
    %cst_47 = arith.constant 2.000000e+01 : f32
    %93 = vector.broadcast %cst_47 : f32 to vector<8x128xf32>
    %94 = arith.minimumf %90, %93 : vector<8x128xf32>
    %95 = math.exp %94 : vector<8x128xf32>
    %96 = math.log1p %95 : vector<8x128xf32>
    %97 = arith.select %92, %90, %96 : vector<8x128xi1>, vector<8x128xf32>
    %c0_48 = arith.constant 0 : index
    %c0_49 = arith.constant 0 : index
    %98 = vector.load %arg12[%c0_48, %c0_49] : memref<128x256xbf16, #tpu.memory_space<vmem>>, vector<128x256xbf16>
    %99 = arith.extf %98 : vector<128x256xbf16> to vector<128x256xf32>
    %c0_50 = arith.constant 0 : index
    %c1152 = arith.constant 1152 : index
    %100 = vector.load %arg4[%c0_50, %c1152] : memref<1x1408xf32, #tpu.memory_space<vmem>>, vector<1x256xf32>
    %cst_51 = arith.constant dense<0.000000e+00> : vector<8x256xf32>
    %101 = tpu.matmul %97, %99, %cst_51 {dimension_numbers = #tpu.dot_dimension_numbers<[1], [0], [0], [1], [0, 0, 1, 1], [], []>} : vector<8x128xf32>, vector<128x256xf32>, vector<8x256xf32> -> vector<8x256xf32>
    %102 = vector.broadcast %100 : vector<1x256xf32> to vector<8x256xf32>
    %103 = arith.addf %101, %102 : vector<8x256xf32>
    %cst_52 = arith.constant 2.000000e+01 : f32
    %104 = vector.broadcast %cst_52 : f32 to vector<8x256xf32>
    %105 = arith.cmpf ogt, %103, %104 : vector<8x256xf32>
    %cst_53 = arith.constant 2.000000e+01 : f32
    %106 = vector.broadcast %cst_53 : f32 to vector<8x256xf32>
    %107 = arith.minimumf %103, %106 : vector<8x256xf32>
    %108 = math.exp %107 : vector<8x256xf32>
    %109 = math.log1p %108 : vector<8x256xf32>
    %110 = arith.select %105, %103, %109 : vector<8x256xi1>, vector<8x256xf32>
    %c1_i32_54 = arith.constant 1 : i32
    %c1_i32_55 = arith.constant 1 : i32
    %111 = arith.muli %c1_i32_54, %c1_i32_55 : i32
    "tpu.region"() ({
      %alloca = memref.alloca() : memref<256x512xbf16, #tpu.memory_space<vmem>>
      %alloca_56 = memref.alloca() : memref<1x512xf32, #tpu.memory_space<vmem>>
      %alloca_57 = memref.alloca() : memref<8x512xf32, #tpu.memory_space<vmem>>
      %c0_i32 = arith.constant 0 : i32
      %112 = arith.cmpi sgt, %111, %c0_i32 : i32
      %113 = arith.extui %112 : i1 to i32
      %c0_i32_58 = arith.constant 0 : i32
      %114 = arith.cmpi ne, %113, %c0_i32_58 : i32
      scf.if %114 {
        %c1_i32_59 = arith.constant 1 : i32
        %c1_i32_60 = arith.constant 1 : i32
        %115 = arith.muli %c1_i32_59, %c1_i32_60 : i32
        %c1_i32_61 = arith.constant 1 : i32
        %116 = arith.subi %115, %c1_i32_61 : i32
        %c0_i32_62 = arith.constant 0 : i32
        %117 = arith.cmpi eq, %116, %c0_i32_62 : i32
        %true = arith.constant true
        %c0_i32_63 = arith.constant 0 : i32
        %c-1_i32 = arith.constant -1 : i32
        %118 = arith.select %true, %c-1_i32, %c0_i32_63 : i32
        %c-1_i32_64 = arith.constant -1 : i32
        %119 = arith.cmpi eq, %118, %c-1_i32_64 : i32
        %c0_i32_65 = arith.constant 0 : i32
        %120 = arith.select %119, %c0_i32_65, %118 : i32
        %true_66 = arith.constant true
        %c0_i32_67 = arith.constant 0 : i32
        %c1_i32_68 = arith.constant 1 : i32
        %121 = arith.select %true_66, %c1_i32_68, %c0_i32_67 : i32
        %c1_i32_69 = arith.constant 1 : i32
        %122 = arith.cmpi eq, %121, %c1_i32_69 : i32
        %c0_i32_70 = arith.constant 0 : i32
        %123 = arith.select %122, %c0_i32_70, %121 : i32
        %true_71 = arith.constant true
        %c0_i32_72 = arith.constant 0 : i32
        %c1_i32_73 = arith.constant 1 : i32
        %124 = arith.select %true_71, %c1_i32_73, %c0_i32_72 : i32
        %c1_i32_74 = arith.constant 1 : i32
        %125 = arith.cmpi eq, %124, %c1_i32_74 : i32
        %c0_i32_75 = arith.constant 0 : i32
        %126 = arith.select %125, %c0_i32_75, %124 : i32
        "tpu.region"() ({
          %148 = tpu.sem_alloc : memref<!tpu.dma_semaphore, #tpu.memory_space<semaphore_mem>>
          tpu.enqueue_dma source(%arg2 : memref<256x512xbf16, #tpu.memory_space<any>>) target(%alloca : memref<256x512xbf16, #tpu.memory_space<vmem>>) target_semaphore(%148 : memref<!tpu.dma_semaphore, #tpu.memory_space<semaphore_mem>>)
          tpu.wait_dma2 semaphore(%148 : memref<!tpu.dma_semaphore, #tpu.memory_space<semaphore_mem>>) src(%arg2 : memref<256x512xbf16, #tpu.memory_space<any>>) dst(%alloca : memref<256x512xbf16, #tpu.memory_space<vmem>>)
          tpu.yield
        }) : () -> ()
        "tpu.region"() ({
          %148 = tpu.sem_alloc : memref<!tpu.dma_semaphore, #tpu.memory_space<semaphore_mem>>
          tpu.enqueue_dma source(%arg3 : memref<1x512xf32, #tpu.memory_space<any>>) target(%alloca_56 : memref<1x512xf32, #tpu.memory_space<vmem>>) target_semaphore(%148 : memref<!tpu.dma_semaphore, #tpu.memory_space<semaphore_mem>>)
          tpu.wait_dma2 semaphore(%148 : memref<!tpu.dma_semaphore, #tpu.memory_space<semaphore_mem>>) src(%arg3 : memref<1x512xf32, #tpu.memory_space<any>>) dst(%alloca_56 : memref<1x512xf32, #tpu.memory_space<vmem>>)
          tpu.yield
        }) : () -> ()
        %c0_i32_76 = arith.constant 0 : i32
        %c0_i32_77 = arith.constant 0 : i32
        %c0_i32_78 = arith.constant 0 : i32
        %c0_i32_79 = arith.constant 0 : i32
        %c0_i32_80 = arith.constant 0 : i32
        %c0_i32_81 = arith.constant 0 : i32
        %c0_i32_82 = arith.constant 0 : i32
        %c0_i32_83 = arith.constant 0 : i32
        %127 = arith.subi %111, %c0_i32_80 : i32
        %128 = arith.addi %c0_i32_80, %127 : i32
        %c1_i32_84 = arith.constant 1 : i32
        %129:3 = scf.for %arg15 = %c0_i32_80 to %128 step %c1_i32_84 iter_args(%arg16 = %c0_i32_81, %arg17 = %c0_i32_82, %arg18 = %c0_i32_83) -> (i32, i32, i32)  : i32 {
          %c1_i32_109 = arith.constant 1 : i32
          %c1_i32_110 = arith.constant 1 : i32
          %148 = arith.muli %c1_i32_109, %c1_i32_110 : i32
          %c0_i32_111 = arith.constant 0 : i32
          %149 = arith.cmpi eq, %arg15, %c0_i32_111 : i32
          %c1_i32_112 = arith.constant 1 : i32
          %150 = arith.subi %148, %c1_i32_112 : i32
          %151 = arith.cmpi eq, %arg15, %150 : i32
          %true_113 = arith.constant true
          %c0_i32_114 = arith.constant 0 : i32
          %c-1_i32_115 = arith.constant -1 : i32
          %152 = arith.select %true_113, %c-1_i32_115, %c0_i32_114 : i32
          %c-1_i32_116 = arith.constant -1 : i32
          %153 = arith.cmpi eq, %152, %c-1_i32_116 : i32
          %c0_i32_117 = arith.constant 0 : i32
          %154 = arith.select %153, %c0_i32_117, %152 : i32
          %true_118 = arith.constant true
          %c0_i32_119 = arith.constant 0 : i32
          %c1_i32_120 = arith.constant 1 : i32
          %155 = arith.select %true_118, %c1_i32_120, %c0_i32_119 : i32
          %c1_i32_121 = arith.constant 1 : i32
          %156 = arith.cmpi eq, %155, %c1_i32_121 : i32
          %c0_i32_122 = arith.constant 0 : i32
          %157 = arith.select %156, %c0_i32_122, %155 : i32
          %true_123 = arith.constant true
          %c0_i32_124 = arith.constant 0 : i32
          %c1_i32_125 = arith.constant 1 : i32
          %158 = arith.select %true_123, %c1_i32_125, %c0_i32_124 : i32
          %c1_i32_126 = arith.constant 1 : i32
          %159 = arith.cmpi eq, %158, %c1_i32_126 : i32
          %c0_i32_127 = arith.constant 0 : i32
          %160 = arith.select %159, %c0_i32_127, %158 : i32
          "tpu.trace_start"() <{level = 10 : i32, message = "ep_run_kernel"}> : () -> ()
          %c0_128 = arith.constant 0 : index
          %c0_129 = arith.constant 0 : index
          %161 = vector.load %alloca[%c0_128, %c0_129] : memref<256x512xbf16, #tpu.memory_space<vmem>>, vector<256x512xbf16>
          %162 = arith.extf %161 : vector<256x512xbf16> to vector<256x512xf32>
          %cst_130 = arith.constant dense<0.000000e+00> : vector<8x512xf32>
          %163 = tpu.matmul %110, %162, %cst_130 {dimension_numbers = #tpu.dot_dimension_numbers<[1], [0], [0], [1], [0, 0, 1, 1], [], []>} : vector<8x256xf32>, vector<256x512xf32>, vector<8x512xf32> -> vector<8x512xf32>
          %c0_131 = arith.constant 0 : index
          %c0_132 = arith.constant 0 : index
          %164 = vector.load %alloca_56[%c0_131, %c0_132] : memref<1x512xf32, #tpu.memory_space<vmem>>, vector<1x512xf32>
          %165 = vector.broadcast %164 : vector<1x512xf32> to vector<8x512xf32>
          %166 = arith.addf %163, %165 : vector<8x512xf32>
          %c0_133 = arith.constant 0 : index
          %c0_134 = arith.constant 0 : index
          %167 = vector.load %alloca_57[%c0_133, %c0_134] : memref<8x512xf32, #tpu.memory_space<vmem>>, vector<8x512xf32>
          tpu.vector_store %alloca_57[%c0_133, %c0_134], %166 {strides = array<i32>} : memref<8x512xf32, #tpu.memory_space<vmem>>, vector<8x512xf32>,
          "tpu.trace_stop"() : () -> ()
          %false = arith.constant false
          %168 = arith.ori %false, %151 : i1
          %c1_i32_135 = arith.constant 1 : i32
          %169 = arith.addi %arg16, %c1_i32_135 : i32
          %170 = arith.select %168, %169, %arg16 : i32
          %false_136 = arith.constant false
          %171 = arith.ori %false_136, %151 : i1
          %c1_i32_137 = arith.constant 1 : i32
          %172 = arith.addi %arg17, %c1_i32_137 : i32
          %173 = arith.select %171, %172, %arg17 : i32
          %true_138 = arith.constant true
          %c0_i32_139 = arith.constant 0 : i32
          %c1_i32_140 = arith.constant 1 : i32
          %174 = arith.select %true_138, %c1_i32_140, %c0_i32_139 : i32
          %c1_i32_141 = arith.constant 1 : i32
          %175 = arith.cmpi eq, %174, %c1_i32_141 : i32
          %c0_i32_142 = arith.constant 0 : i32
          %176 = arith.select %175, %c0_i32_142, %174 : i32
          %c0_i32_143 = arith.constant 0 : i32
          scf.yield %170, %173, %c0_i32_143 : i32, i32, i32
        }
        %c1_i32_85 = arith.constant 1 : i32
        %130 = arith.subi %129#2, %c1_i32_85 : i32
        %true_86 = arith.constant true
        %131 = arith.select %true_86, %130, %129#2 : i32
        %c-1_i32_87 = arith.constant -1 : i32
        %132 = arith.cmpi eq, %131, %c-1_i32_87 : i32
        %c0_i32_88 = arith.constant 0 : i32
        %133 = arith.select %132, %c0_i32_88, %131 : i32
        %c1_i32_89 = arith.constant 1 : i32
        %134 = arith.subi %111, %c1_i32_89 : i32
        %c1_i32_90 = arith.constant 1 : i32
        %c1_i32_91 = arith.constant 1 : i32
        %135 = arith.muli %c1_i32_90, %c1_i32_91 : i32
        %c0_i32_92 = arith.constant 0 : i32
        %136 = arith.cmpi eq, %134, %c0_i32_92 : i32
        %c1_i32_93 = arith.constant 1 : i32
        %137 = arith.subi %135, %c1_i32_93 : i32
        %138 = arith.cmpi eq, %134, %137 : i32
        %true_94 = arith.constant true
        %c0_i32_95 = arith.constant 0 : i32
        %c-1_i32_96 = arith.constant -1 : i32
        %139 = arith.select %true_94, %c-1_i32_96, %c0_i32_95 : i32
        %c-1_i32_97 = arith.constant -1 : i32
        %140 = arith.cmpi eq, %139, %c-1_i32_97 : i32
        %c0_i32_98 = arith.constant 0 : i32
        %141 = arith.select %140, %c0_i32_98, %139 : i32
        %true_99 = arith.constant true
        %c0_i32_100 = arith.constant 0 : i32
        %c1_i32_101 = arith.constant 1 : i32
        %142 = arith.select %true_99, %c1_i32_101, %c0_i32_100 : i32
        %c1_i32_102 = arith.constant 1 : i32
        %143 = arith.cmpi eq, %142, %c1_i32_102 : i32
        %c0_i32_103 = arith.constant 0 : i32
        %144 = arith.select %143, %c0_i32_103, %142 : i32
        %true_104 = arith.constant true
        %c0_i32_105 = arith.constant 0 : i32
        %c1_i32_106 = arith.constant 1 : i32
        %145 = arith.select %true_104, %c1_i32_106, %c0_i32_105 : i32
        %c1_i32_107 = arith.constant 1 : i32
        %146 = arith.cmpi eq, %145, %c1_i32_107 : i32
        %c0_i32_108 = arith.constant 0 : i32
        %147 = arith.select %146, %c0_i32_108, %145 : i32
        "tpu.region"() ({
          %148 = tpu.sem_alloc : memref<!tpu.dma_semaphore, #tpu.memory_space<semaphore_mem>>
          tpu.enqueue_dma source(%alloca_57 : memref<8x512xf32, #tpu.memory_space<vmem>>) target(%arg13 : memref<8x512xf32, #tpu.memory_space<any>>) target_semaphore(%148 : memref<!tpu.dma_semaphore, #tpu.memory_space<semaphore_mem>>)
          tpu.wait_dma2 semaphore(%148 : memref<!tpu.dma_semaphore, #tpu.memory_space<semaphore_mem>>) src(%alloca_57 : memref<8x512xf32, #tpu.memory_space<vmem>>) dst(%arg13 : memref<8x512xf32, #tpu.memory_space<any>>)
          tpu.yield
        }) : () -> ()
      } else {
      }
      tpu.yield
    }) : () -> ()
    return
  }
}

</mosaic_0001>

<bundles_post_ra>
// kernel: autoencoder_forward.1
= control target key start
LH: loop header
LB: loop body
LE: loop exit
PB: predicated region body
PF: predicated region fallthrough
CT: control target
= control target key end

     0   :  { %18 = vsyncpa [#allocation4], 0  ;;  %s2848_s0 = inlined_call_operand.vmem [shape: f32[8,512], index: 0, kind: input, shape index: {}]   ;;  %s2849_s1 = inlined_call_operand.hbm [shape: bf16[512,256], index: 1, kind: input, shape index: {}]   ;;  %s2850_s2 = inlined_call_operand.hbm [shape: bf16[256,512], index: 2, kind: input, shape index: {}]   ;;  %s2851_s3 = inlined_call_operand.vmem [shape: f32[1,512], index: 3, kind: input, shape index: {}]   ;;  %s2852_s4 = inlined_call_operand.vmem [shape: f32[1,1408], index: 4, kind: input, shape index: {}]   ;;  %s2853_s5 = inlined_call_operand.hbm [shape: bf16[256,128], index: 5, kind: input, shape index: {}]   ;;  %s2854_s6 = inlined_call_operand.hbm [shape: bf16[128,128], index: 6, kind: input, shape index: {}]   ;;  %s2855_s7 = inlined_call_operand.hbm [shape: bf16[128,128], index: 7, kind: input, shape index: {}]   ;;  %s2856_s8 = inlined_call_operand.hbm [shape: bf16[128,128], index: 8, kind: input, shape index: {}]   ;;  %s2857_s9 = inlined_call_operand.hbm [shape: bf16[128,128], index: 9, kind: input, shape index: {}]   ;;  %s2858_s10 = inlined_call_operand.hbm [shape: bf16[128,128], index: 10, kind: input, shape index: {}]   ;;  %s2859_s11 = inlined_call_operand.hbm [shape: bf16[128,128], index: 11, kind: input, shape index: {}]   ;;  %s2860_s12 = inlined_call_operand.hbm [shape: bf16[128,256], index: 12, kind: input, shape index: {}]   ;;  %s2861_s13 = inlined_call_operand.vmem [shape: f32[8,512], index: 13, kind: output, shape index: {}]  }
   0x1   :  { %19 = vsyncpa [#allocation6], 0 }
   0x2   :  { %20 = vsyncpa [#allocation9], 0 }
   0x3   :  { %21 = vsyncpa [#allocation12], 0 }
   0x4   :  { %22 = vsyncpa [#allocation15], 0  ;;  %s42_s27 = sshll.u32 %s2854_s6, 4  ;;  %s2357_s28 = smov [#allocation5]   ;;  %s43_s27 = int_to_ptr.hbm [resolvable:$true] %s42_s27 }
   0x5   :  { %s44_s29 = sshll.u32 %s2357_s28, 4  ;;  %s68_s15 = sshll.u32 %s2856_s8, 4  ;;  %s45_s29 = int_to_ptr.vmem [resolvable:$true] %s44_s29  ;;  %s69_s15 = int_to_ptr.hbm [resolvable:$true] %s68_s15 }
   0x6   :  { %s2358_s16 = smov 64   ;;  %s2359_s17 = smov 4  }
   0x7   :  { %50 = dma.hbm_to_vmem [thread:$0]  %s43_s27, 1024, %s45_s29, [#allocation6], %s2358_s16, %s2358_s16, %s2359_s17  }
   0x8   :  { %s2360_s18 = smov [#allocation8]   ;;  %s94_s6 = sshll.u32 %s2858_s10, 4  ;;  %s95_s6 = int_to_ptr.hbm [resolvable:$true] %s94_s6 }
   0x9   :  { %s70_s19 = sshll.u32 %s2360_s18, 4  ;;  %s29_s23 = sshll.u32 %s2853_s5, 4  ;;  %s71_s19 = int_to_ptr.vmem [resolvable:$true] %s70_s19  ;;  %s30_s23 = int_to_ptr.hbm [resolvable:$true] %s29_s23 }
   0xa   :  { %76 = dma.hbm_to_vmem [thread:$0]  %s69_s15, 1024, %s71_s19, [#allocation9], %s2358_s16, %s2358_s16, %s2359_s17  }
   0xb   :  { %s2361_s24 = smov [#allocation11]   ;;  %s2362_s26 = smov [#allocation3]  }
   0xc   :  { %s96_s25 = sshll.u32 %s2361_s24, 4  ;;  %s31_s10 = sshll.u32 %s2362_s26, 4  ;;  %s97_s25 = int_to_ptr.vmem [resolvable:$true] %s96_s25  ;;  %s32_s10 = int_to_ptr.vmem [resolvable:$true] %s31_s10 }
   0xd   :  { %102 = dma.hbm_to_vmem [thread:$0]  %s95_s6, 1024, %s97_s25, [#allocation12], %s2358_s16, %s2358_s16, %s2359_s17  }
   0xe   :  { %s55_s29 = sshll.u32 %s2855_s7, 4  ;;  %s81_s14 = sshll.u32 %s2857_s9, 4  ;;  %s56_s29 = int_to_ptr.hbm [resolvable:$true] %s55_s29  ;;  %s82_s14 = int_to_ptr.hbm [resolvable:$true] %s81_s14 }
   0xf   :  { %37 = dma.hbm_to_vmem [thread:$0]  %s30_s23, 2048, %s32_s10, [#allocation4], %s2358_s16, %s2358_s16, %s2359_s17  }
  0x10   :  { %s2363_s15 = smov [#allocation7]   ;;  %s2364_s19 = smov [#allocation10]  }
  0x11   :  { %s57_s18 = sshll.u32 %s2363_s15, 4  ;;  %s83_s7 = sshll.u32 %s2364_s19, 4  ;;  %s58_s18 = int_to_ptr.vmem [resolvable:$true] %s57_s18  ;;  %s84_s7 = int_to_ptr.vmem [resolvable:$true] %s83_s7 }
  0x12   :  { %63 = dma.hbm_to_vmem [thread:$0]  %s56_s29, 1024, %s58_s18, [#allocation6], %s2358_s16, %s2358_s16, %s2359_s17  }
  0x13   :  { %s107_s6 = sshll.u32 %s2859_s11, 4  ;;  %s120_s22 = sshll.u32 %s2860_s12, 4  ;;  %s108_s6 = int_to_ptr.hbm [resolvable:$true] %s107_s6  ;;  %s121_s22 = int_to_ptr.hbm [resolvable:$true] %s120_s22 }
  0x14   :  { %89 = dma.hbm_to_vmem [thread:$0]  %s82_s14, 1024, %s84_s7, [#allocation9], %s2358_s16, %s2358_s16, %s2359_s17  }
  0x15   :  { %s2365_s23 = smov [#allocation13]   ;;  %s2366_s25 = smov [#allocation14]  }
  0x16   :  { %s109_s24 = sshll.u32 %s2365_s23, 4  ;;  %s122_s11 = sshll.u32 %s2366_s25, 4  ;;  %s110_s24 = int_to_ptr.vmem [resolvable:$true] %s109_s24  ;;  %s123_s11 = int_to_ptr.vmem [resolvable:$true] %s122_s11 }
  0x17   :  { %115 = dma.hbm_to_vmem [thread:$0]  %s108_s6, 1024, %s110_s24, [#allocation12], %s2358_s16, %s2358_s16, %s2359_s17  }
  0x18   :  { %s2367_s26 = smov 128   ;;  %s2368_s10 = smov 8  }
  0x19   :  { %128 = dma.hbm_to_vmem [thread:$0]  %s121_s22, 2048, %s123_s11, [#allocation15], %s2367_s26, %s2367_s26, %s2368_s10  }
  0x1a   :  { %2337 = dma.done.wait [#allocation4], 2048  }
  0x1b   :  { %2338 = vsyncadd [#allocation4], 4294965248 }
  0x1c   :  { %2339 = dma.done.wait [#allocation6], 2048  }
  0x1d   :  { %2340 = vsyncadd [#allocation6], 4294965248 }
  0x1e   :  { %2341 = dma.done.wait [#allocation9], 2048  }
  0x1f   :  { %2342 = vsyncadd [#allocation9], 4294965248 }
  0x20   :  { %2343 = dma.done.wait [#allocation12], 2048  }
  0x21   :  { %2344 = vsyncadd [#allocation12], 4294965248 }
  0x22   :  { %2345 = dma.done.wait [#allocation15], 2048  }
  0x23   :  { %2346 = vsyncadd [#allocation15], 4294965248 }
  0x24   :  { %v2489_v0 = vld [vmem:[%s2848_s0] sm:$0xff]  ;;  %v2494_v1 = vld [vmem:[%s2848_s0 + $0x8] sm:$0xff]  ;;  %v2499_v2 = vld [vmem:[%s2848_s0 + $0x10] sm:$0xff] }
  0x25   :  { %2880 = vst [vmem:[#allocation45_spill] sm:$0xff] %v2489_v0  ;;  %v2504_v3 = vld [vmem:[%s2848_s0 + $0x18] sm:$0xff] }
  0x26   :  { %2881 = vst [vmem:[#allocation46_spill] sm:$0xff] %v2494_v1 }
  0x27   :  { %2882 = vst [vmem:[#allocation47_spill] sm:$0xff] %v2499_v2 }
  0x28   :  { %2883 = vst [vmem:[#allocation48_spill] sm:$0xff] %v2504_v3 }
  0x29   :  { %186 = vsyncadd [#allocation18], 512 }
  0x2a   :  { %2347 = dma.done.wait [#allocation18], 512 }
  0x2b   :  { %2348 = vsyncadd [#allocation18], 4294966784 }
  0x2c   :  { %s198_s18 = sshll.u32 %s2849_s1, 4  ;;  %s2369_s19 = smov [#allocation17]   ;;  %s199_s18 = int_to_ptr.hbm [resolvable:$true] %s198_s18 }
  0x2d   :  { %s200_s7 = sshll.u32 %s2369_s19, 4  ;;  %s201_s7 = int_to_ptr.vmem [resolvable:$true] %s200_s7 }
  0x2e   :  { %203 = dma.hbm_to_vmem [thread:$0]  %s199_s18, 8192, %s201_s7, [#allocation20] }
  0x2f   :  { %2349 = dma.done.wait [#allocation20], 8192 }
  0x30   :  { %2350 = vsyncadd [#allocation20], 4294959104  ;;  %v2509_v4 = vld [vmem:[#allocation17 + $0x178] sm:$0xff]  ;;  %v2511_v5 = vld [vmem:[#allocation17 + $0x170] sm:$0xff] }
  0x31   :  { %v2513_v6 = vld [vmem:[#allocation17 + $0x1f8] sm:$0xff]  ;;  %v372_v7 = vunpack.c.l.bf16 %v2509_v4  ;;  %v370_v8 = vunpack.c.l.bf16 %v2511_v5  ;;  %v2522_v12 = vld [vmem:[#allocation17 + $0x168] sm:$0xff]  ;;  %v2526_v15 = vld [vmem:[#allocation17 + $0x1f0] sm:$0xff] }
  0x32   :  { %v404_v9 = vunpack.c.l.bf16 %v2513_v6  ;;  %v2518_v10 = vld [vmem:[#allocation17 + $0x78] sm:$0xff]  ;;  %v2528_v16 = vld [vmem:[#allocation17 + $0x70] sm:$0xff]  ;;  %v368_v18 = vunpack.c.l.bf16 %v2522_v12  ;;  %v402_v19 = vunpack.c.l.bf16 %v2526_v15  ;;  %v2536_v22 = vld [vmem:[#allocation17 + $0x160] sm:$0xff] }
  0x33   :  { %v2520_v11 = vld [vmem:[#allocation17 + $0xf8] sm:$0xff]  ;;  %v308_v13 = vunpack.c.l.bf16 %v2518_v10  ;;  %v2530_v17 = vld [vmem:[#allocation17 + $0xf0] sm:$0xff]  ;;  %446 = vmatpush.msra.mxu2 %v372_v7  ;;  %v306_v20 = vunpack.c.l.bf16 %v2528_v16  ;;  %v2538_v23 = vld [vmem:[#allocation17 + $0x1e8] sm:$0xff]  ;;  %v366_v30 = vunpack.c.l.bf16 %v2536_v22 }
  0x34   :  { %v340_v14 = vunpack.c.l.bf16 %v2520_v11  ;;  %466 = vmatpush.msra.mxu3 %v404_v9  ;;  %v338_v21 = vunpack.c.l.bf16 %v2530_v17  ;;  %v2540_v24 = vld [vmem:[#allocation17 + $0x68] sm:$0xff]  ;;  %v400_v25 = vunpack.c.l.bf16 %v2538_v23  ;;  %v2546_v28 = vld [vmem:[#allocation17 + $0x158] sm:$0xff]  ;;  %v2548_v29 = vld [vmem:[#allocation17 + $0x1e0] sm:$0xff] }
  0x35   :  { %406 = vmatpush.msra.mxu0 %v308_v13  ;;  %v304_v26 = vunpack.c.l.bf16 %v2540_v24  ;;  %v2544_v27 = vld [vmem:[#allocation17 + $0xe8] sm:$0xff]  ;;  %447 = vmatpush.msra.mxu2 %v370_v8  ;;  %v398_v32 = vunpack.c.l.bf16 %v2548_v29  ;;  %v2553_v33 = vld [vmem:[#allocation17 + $0x60] sm:$0xff]  ;;  %v2557_v35 = vld [vmem:[#allocation17 + $0x150] sm:$0xff]  ;;  %v364_v41 = vunpack.c.l.bf16 %v2546_v28 }
  0x36   :  { %426 = vmatpush.msra.mxu1 %v340_v14  ;;  %467 = vmatpush.msra.mxu3 %v402_v19  ;;  %v336_v31 = vunpack.c.l.bf16 %v2544_v27  ;;  %v2555_v34 = vld [vmem:[#allocation17 + $0xe0] sm:$0xff]  ;;  %v302_v36 = vunpack.c.l.bf16 %v2553_v33  ;;  %v2561_v38 = vld [vmem:[#allocation17 + $0x1d8] sm:$0xff]  ;;  %v2569_v43 = vld [vmem:[#allocation17 + $0x1d0] sm:$0xff]  ;;  %v362_v50 = vunpack.c.l.bf16 %v2557_v35 }
  0x37   :  { %407 = vmatpush.msra.mxu0 %v306_v20  ;;  %v334_v37 = vunpack.c.l.bf16 %v2555_v34  ;;  %v2563_v39 = vld [vmem:[#allocation17 + $0x58] sm:$0xff]  ;;  %448 = vmatpush.msra.mxu2 %v368_v18  ;;  %v396_v42 = vunpack.c.l.bf16 %v2561_v38  ;;  %v2571_v44 = vld [vmem:[#allocation17 + $0x50] sm:$0xff]  ;;  %v2575_v47 = vld [vmem:[#allocation17 + $0x148] sm:$0xff]  ;;  %v394_v51 = vunpack.c.l.bf16 %v2569_v43 }
  0x38   :  { %427 = vmatpush.msra.mxu1 %v338_v21  ;;  %v2565_v40 = vld [vmem:[#allocation17 + $0xd8] sm:$0xff]  ;;  %468 = vmatpush.msra.mxu3 %v400_v25  ;;  %v300_v45 = vunpack.c.l.bf16 %v2563_v39  ;;  %v2577_v48 = vld [vmem:[#allocation17 + $0xd0] sm:$0xff]  ;;  %v2579_v49 = vld [vmem:[#allocation17 + $0x1c8] sm:$0xff]  ;;  %v298_v54 = vunpack.c.l.bf16 %v2571_v44  ;;  %v360_v58 = vunpack.c.l.bf16 %v2575_v47 }
  0x39   :  { %408 = vmatpush.msra.mxu0 %v304_v26  ;;  %v332_v46 = vunpack.c.l.bf16 %v2565_v40  ;;  %449 = vmatpush.msra.mxu2 %v366_v30  ;;  %v2583_v52 = vld [vmem:[#allocation17 + $0x48] sm:$0xff]  ;;  %v330_v55 = vunpack.c.l.bf16 %v2577_v48  ;;  %v2589_v56 = vld [vmem:[#allocation17 + $0x140] sm:$0xff]  ;;  %v392_v59 = vunpack.c.l.bf16 %v2579_v49  ;;  %v2601_v7 = vld [vmem:[#allocation17 + $0x138] sm:$0xff] }
  0x3a   :  { %428 = vmatpush.msra.mxu1 %v336_v31  ;;  %469 = vmatpush.msra.mxu3 %v398_v32  ;;  %v2585_v53 = vld [vmem:[#allocation17 + $0xc8] sm:$0xff]  ;;  %v2591_v57 = vld [vmem:[#allocation17 + $0x1c0] sm:$0xff]  ;;  %v296_v62 = vunpack.c.l.bf16 %v2583_v52  ;;  %v2603_v8 = vld [vmem:[#allocation17 + $0x1b8] sm:$0xff]  ;;  %v358_v9 = vunpack.c.l.bf16 %v2589_v56  ;;  %v356_v26 = vunpack.c.l.bf16 %v2601_v7 }
  0x3b   :  { %409 = vmatpush.msra.mxu0 %v302_v36  ;;  %450 = vmatpush.msra.mxu2 %v364_v41  ;;  %v2595_v60 = vld [vmem:[#allocation17 + $0x40] sm:$0xff]  ;;  %v328_v63 = vunpack.c.l.bf16 %v2585_v53  ;;  %v390_v13 = vunpack.c.l.bf16 %v2591_v57  ;;  %v2607_v14 = vld [vmem:[#allocation17 + $0x38] sm:$0xff]  ;;  %v2613_v21 = vld [vmem:[#allocation17 + $0x130] sm:$0xff]  ;;  %v388_v30 = vunpack.c.l.bf16 %v2603_v8 }
  0x3c   :  { %429 = vmatpush.msra.mxu1 %v334_v37  ;;  %470 = vmatpush.msra.mxu3 %v396_v42  ;;  %v2597_v61 = vld [vmem:[#allocation17 + $0xc0] sm:$0xff]  ;;  %v2609_v18 = vld [vmem:[#allocation17 + $0xb8] sm:$0xff]  ;;  %v294_v19 = vunpack.c.l.bf16 %v2595_v60  ;;  %v2615_v25 = vld [vmem:[#allocation17 + $0x1b0] sm:$0xff]  ;;  %v292_v36 = vunpack.c.l.bf16 %v2607_v14 }
  0x3d   :  { %410 = vmatpush.msra.mxu0 %v300_v45  ;;  %451 = vmatpush.msra.mxu2 %v362_v50  ;;  %v326_v20 = vunpack.c.l.bf16 %v2597_v61  ;;  %v2619_v31 = vld [vmem:[#allocation17 + $0x30] sm:$0xff]  ;;  %v324_v37 = vunpack.c.l.bf16 %v2609_v18  ;;  %v2625_v41 = vld [vmem:[#allocation17 + $0x128] sm:$0xff]  ;;  %v354_v45 = vunpack.c.l.bf16 %v2613_v21  ;;  %v2649_v1 = vld [vmem:[#allocation17 + $0x118] sm:$0xff] }
  0x3e   :  { %430 = vmatpush.msra.mxu1 %v332_v46  ;;  %471 = vmatpush.msra.mxu3 %v394_v51  ;;  %v2621_v32 = vld [vmem:[#allocation17 + $0xb0] sm:$0xff]  ;;  %v2627_v42 = vld [vmem:[#allocation17 + $0x1a8] sm:$0xff]  ;;  %v386_v46 = vunpack.c.l.bf16 %v2615_v25  ;;  %2890 = vst [vmem:[#allocation55_spill] sm:$0xff] %v2649_v1  ;;  %v2651_v0 = vld [vmem:[#allocation17 + $0x198] sm:$0xff] }
  0x3f   :  { %411 = vmatpush.msra.mxu0 %v298_v54  ;;  %452 = vmatpush.msra.mxu2 %v360_v58  ;;  %v2631_v50 = vld [vmem:[#allocation17 + $0x28] sm:$0xff]  ;;  %v290_v54 = vunpack.c.l.bf16 %v2619_v31  ;;  %v2637_v58 = vld [vmem:[#allocation17 + $0x120] sm:$0xff]  ;;  %2891 = vst [vmem:[#allocation56_spill] sm:$0xff] %v2651_v0  ;;  %v2655_v3 = vld [vmem:[#allocation17 + $0x18] sm:$0xff] }
  0x40   :  { %431 = vmatpush.msra.mxu1 %v330_v55  ;;  %472 = vmatpush.msra.mxu3 %v392_v59  ;;  %2884 = vst [vmem:[#allocation49_spill] sm:$0xff] %v2631_v50  ;;  %v2633_v51 = vld [vmem:[#allocation17 + $0xa8] sm:$0xff]  ;;  %v322_v55 = vunpack.c.l.bf16 %v2621_v32  ;;  %v2639_v59 = vld [vmem:[#allocation17 + $0x1a0] sm:$0xff]  ;;  %v2657_v2 = vld [vmem:[#allocation17 + $0x98] sm:$0xff] }
  0x41   :  { %412 = vmatpush.msra.mxu0 %v296_v62  ;;  %453 = vmatpush.msra.mxu2 %v358_v9  ;;  %2885 = vst [vmem:[#allocation50_spill] sm:$0xff] %v2633_v51  ;;  %v352_v62 = vunpack.c.l.bf16 %v2625_v41  ;;  %v2643_v9 = vld [vmem:[#allocation17 + $0x20] sm:$0xff] }
  0x42   :  { %432 = vmatpush.msra.mxu1 %v328_v63  ;;  %473 = vmatpush.msra.mxu3 %v390_v13  ;;  %2886 = vst [vmem:[#allocation51_spill] sm:$0xff] %v2637_v58  ;;  %v384_v63 = vunpack.c.l.bf16 %v2627_v42  ;;  %v2645_v13 = vld [vmem:[#allocation17 + $0xa0] sm:$0xff] }
  0x43   :  { %413 = vmatpush.msra.mxu0 %v294_v19  ;;  %2887 = vst [vmem:[#allocation52_spill] sm:$0xff] %v2639_v59  ;;  %454 = vmatpush.msra.mxu2 %v356_v26  ;;  %v288_v19 = vunpack.c.l.bf16 %v2631_v50  ;;  %v350_v26 = vunpack.c.l.bf16 %v2637_v58  ;;  %v2663_v50 = vld [vmem:[#allocation17 + $0x190] sm:$0xff] }
  0x44   :  { %433 = vmatpush.msra.mxu1 %v326_v20  ;;  %474 = vmatpush.msra.mxu3 %v388_v30  ;;  %2888 = vst [vmem:[#allocation53_spill] sm:$0xff] %v2643_v9  ;;  %v320_v20 = vunpack.c.l.bf16 %v2633_v51  ;;  %v382_v30 = vunpack.c.l.bf16 %v2639_v59  ;;  %v2661_v51 = vld [vmem:[#allocation17 + $0x110] sm:$0xff] }
  0x45   :  { %2889 = vst [vmem:[#allocation54_spill] sm:$0xff] %v2645_v13  ;;  %414 = vmatpush.msra.mxu0 %v292_v36  ;;  %455 = vmatpush.msra.mxu2 %v354_v45  ;;  %v286_v36 = vunpack.c.l.bf16 %v2643_v9  ;;  %v348_v45 = vunpack.c.l.bf16 %v2649_v1  ;;  %v2667_v59 = vld [vmem:[#allocation17 + $0x10] sm:$0xff]  ;;  %v2675_v9 = vld [vmem:[#allocation17 + $0x188] sm:$0xff] }
  0x46   :  { %434 = vmatpush.msra.mxu1 %v324_v37  ;;  %475 = vmatpush.msra.mxu3 %v386_v46  ;;  %2892 = vst [vmem:[#allocation57_spill] sm:$0xff] %v2655_v3  ;;  %v318_v37 = vunpack.c.l.bf16 %v2645_v13  ;;  %v380_v46 = vunpack.c.l.bf16 %v2651_v0  ;;  %v2669_v58 = vld [vmem:[#allocation17 + $0x90] sm:$0xff]  ;;  %v2673_v13 = vld [vmem:[#allocation17 + $0x108] sm:$0xff] }
  0x47   :  { %2893 = vst [vmem:[#allocation58_spill] sm:$0xff] %v2657_v2  ;;  %415 = vmatpush.msra.mxu0 %v290_v54  ;;  %456 = vmatpush.msra.mxu2 %v352_v62  ;;  %v284_v54 = vunpack.c.l.bf16 %v2655_v3  ;;  %v346_v62 = vunpack.c.l.bf16 %v2661_v51  ;;  %v2679_v0 = vld [vmem:[#allocation17 + $0x8] sm:$0xff]  ;;  %v2687_v3 = vld [vmem:[#allocation17 + $0x180] sm:$0xff] }
  0x48   :  { %435 = vmatpush.msra.mxu1 %v322_v55  ;;  %2894 = vst [vmem:[#allocation59_spill] sm:$0xff] %v2663_v50  ;;  %476 = vmatpush.msra.mxu3 %v384_v63  ;;  %v316_v55 = vunpack.c.l.bf16 %v2657_v2  ;;  %v378_v63 = vunpack.c.l.bf16 %v2663_v50  ;;  %v2681_v1 = vld [vmem:[#allocation17 + $0x88] sm:$0xff]  ;;  %v2685_v2 = vld [vmem:[#allocation17 + $0x100] sm:$0xff]  ;;  %v280_v50 = vunpack.c.l.bf16 %v2679_v0 }
  0x49   :  { %2895 = vst [vmem:[#allocation60_spill] sm:$0xff] %v2667_v59  ;;  %416 = vmatpush.msra.mxu0 %v288_v19  ;;  %457 = vmatpush.msra.mxu2 %v350_v26  ;;  %v282_v19 = vunpack.c.l.bf16 %v2667_v59  ;;  %v344_v26 = vunpack.c.l.bf16 %v2673_v13  ;;  %v2695_v59 = vld [vmem:[#allocation17 + $0x80] sm:$0xff] }
  0x4a   :  { %2896 = vst [vmem:[#allocation61_spill] sm:$0xff] %v2669_v58  ;;  %436 = vmatpush.msra.mxu1 %v320_v20  ;;  %477 = vmatpush.msra.mxu3 %v382_v30  ;;  %v314_v20 = vunpack.c.l.bf16 %v2669_v58  ;;  %v376_v30 = vunpack.c.l.bf16 %v2675_v9  ;;  %v342_v58 = vunpack.c.l.bf16 %v2685_v2 }
  0x4b   :  { %2897 = vst [vmem:[#allocation62_spill] sm:$0xff] %v2681_v1  ;;  %417 = vmatpush.msra.mxu0 %v286_v36  ;;  %458 = vmatpush.msra.mxu2 %v348_v45  ;;  %v312_v36 = vunpack.c.l.bf16 %v2681_v1  ;;  %v374_v45 = vunpack.c.l.bf16 %v2687_v3  ;;  %v310_v1 = vunpack.c.l.bf16 %v2695_v59 }
  0x4c   :  { %437 = vmatpush.msra.mxu1 %v318_v37  ;;  %478 = vmatpush.msra.mxu3 %v380_v46  ;;  %v2693_v37 = vld [vmem:[#allocation17] sm:$0xff]  ;;  %v373_v46 = vunpack.c.h.bf16 %v2509_v4  ;;  %v403_v4 = vunpack.c.h.bf16 %v2526_v15  ;;  %v337_v15 = vunpack.c.h.bf16 %v2544_v27  ;;  %v333_v27 = vunpack.c.h.bf16 %v2565_v40 }
  0x4d   :  { %418 = vmatpush.msra.mxu0 %v284_v54  ;;  %459 = vmatpush.msra.mxu2 %v346_v62  ;;  %v405_v54 = vunpack.c.h.bf16 %v2513_v6  ;;  %v371_v62 = vunpack.c.h.bf16 %v2511_v5  ;;  %v369_v6 = vunpack.c.h.bf16 %v2522_v12  ;;  %v401_v5 = vunpack.c.h.bf16 %v2538_v23 }
  0x4e   :  { %438 = vmatpush.msra.mxu1 %v316_v55  ;;  %479 = vmatpush.msra.mxu3 %v378_v63  ;;  %v278_v55 = vunpack.c.l.bf16 %v2693_v37  ;;  %v309_v63 = vunpack.c.h.bf16 %v2518_v10  ;;  %v367_v10 = vunpack.c.h.bf16 %v2536_v22  ;;  %v399_v12 = vunpack.c.h.bf16 %v2548_v29 }
  0x4f   :  { %419 = vmatpush.msra.mxu0 %v282_v19  ;;  %460 = vmatpush.msra.mxu2 %v344_v26  ;;  %v341_v19 = vunpack.c.h.bf16 %v2520_v11  ;;  %v305_v11 = vunpack.c.h.bf16 %v2540_v24  ;;  %v397_v22 = vunpack.c.h.bf16 %v2561_v38  ;;  %v363_v23 = vunpack.c.h.bf16 %v2557_v35 }
  0x50   :  { %439 = vmatpush.msra.mxu1 %v314_v20  ;;  %480 = vmatpush.msra.mxu3 %v376_v30  ;;  %v307_v20 = vunpack.c.h.bf16 %v2528_v16  ;;  %v303_v16 = vunpack.c.h.bf16 %v2553_v33  ;;  %v301_v24 = vunpack.c.h.bf16 %v2563_v39  ;;  %v361_v29 = vunpack.c.h.bf16 %v2575_v47  ;;  %v2902_v30 = vld [vmem:[#allocation52_spill] sm:$0xff] }
  0x51   :  { %420 = vmatpush.msra.mxu0 %v280_v50  ;;  %461 = vmatpush.msra.mxu2 %v342_v58  ;;  %v339_v50 = vunpack.c.h.bf16 %v2530_v17  ;;  %v335_v17 = vunpack.c.h.bf16 %v2555_v34  ;;  %v299_v33 = vunpack.c.h.bf16 %v2571_v44  ;;  %v331_v34 = vunpack.c.h.bf16 %v2577_v48  ;;  %v2899_v58 = vld [vmem:[#allocation49_spill] sm:$0xff] }
  0x52   :  { %440 = vmatpush.msra.mxu1 %v312_v36  ;;  %481 = vmatpush.msra.mxu3 %v374_v45  ;;  %v393_v35 = vunpack.c.h.bf16 %v2579_v49  ;;  %v359_v38 = vunpack.c.h.bf16 %v2589_v56  ;;  %v297_v39 = vunpack.c.h.bf16 %v2583_v52  ;;  %v329_v40 = vunpack.c.h.bf16 %v2585_v53  ;;  %v2904_v45 = vld [vmem:[#allocation54_spill] sm:$0xff] }
  0x53   :  { %526 = vmatpush.msrb.mxu2 %v373_v46  ;;  %421 = vmatpush.msra.mxu0 %v278_v55  ;;  %v357_v44 = vunpack.c.h.bf16 %v2601_v7  ;;  %v295_v47 = vunpack.c.h.bf16 %v2595_v60  ;;  %v327_v48 = vunpack.c.h.bf16 %v2597_v61  ;;  %v389_v49 = vunpack.c.h.bf16 %v2603_v8  ;;  %v2905_v55 = vld [vmem:[#allocation47_spill] sm:$0xff] }
  0x54   :  { %546 = vmatpush.msrb.mxu3 %v405_v54  ;;  %441 = vmatpush.msra.mxu1 %v310_v1  ;;  %v365_v1 = vunpack.c.h.bf16 %v2546_v28  ;;  %v395_v28 = vunpack.c.h.bf16 %v2569_v43  ;;  %v391_v43 = vunpack.c.h.bf16 %v2591_v57  ;;  %v355_v52 = vunpack.c.h.bf16 %v2613_v21 }
  0x55   :  { %527 = vmatpush.msrb.mxu2 %v371_v62  ;;  %486 = vmatpush.msrb.mxu0 %v309_v63  ;;  %v293_v53 = vunpack.c.h.bf16 %v2607_v14  ;;  %v325_v56 = vunpack.c.h.bf16 %v2609_v18  ;;  %v387_v57 = vunpack.c.h.bf16 %v2615_v25  ;;  %v353_v60 = vunpack.c.h.bf16 %v2625_v41  ;;  %v2898_v14 = vld [vmem:[#allocation51_spill] sm:$0xff]  ;;  %v2900_v25 = vld [vmem:[#allocation50_spill] sm:$0xff]  ;;  %v2906_v62 = vld [vmem:[#allocation56_spill] sm:$0xff] }
  0x56   :  { %506 = vmatpush.msrb.mxu1 %v341_v19  ;;  %547 = vmatpush.msrb.mxu3 %v403_v4  ;;  %v291_v61 = vunpack.c.h.bf16 %v2619_v31  ;;  %v323_v7 = vunpack.c.h.bf16 %v2621_v32  ;;  %v385_v8 = vunpack.c.h.bf16 %v2627_v42  ;;  %v351_v21 = vunpack.c.h.bf16 %v2898_v14  ;;  %v2901_v41 = vld [vmem:[#allocation55_spill] sm:$0xff]  ;;  %v2903_v32 = vld [vmem:[#allocation53_spill] sm:$0xff]  ;;  %v1983_v14 = vld [vmem:[#allocation3 + $0x28] sm:$0xff]  }
  0x57   :  { %528 = vmatpush.msrb.mxu2 %v369_v6  ;;  %487 = vmatpush.msrb.mxu0 %v307_v20  ;;  %v289_v18 = vunpack.c.h.bf16 %v2899_v58  ;;  %v321_v26 = vunpack.c.h.bf16 %v2900_v25  ;;  %v349_v31 = vunpack.c.h.bf16 %v2901_v41  ;;  %v383_v36 = vunpack.c.h.bf16 %v2902_v30  ;;  %v2907_v19 = vld [vmem:[#allocation57_spill] sm:$0xff]  ;;  %v2908_v6 = vld [vmem:[#allocation48_spill] sm:$0xff]  ;;  %v2909_v20 = vld [vmem:[#allocation58_spill] sm:$0xff] }
  0x58   :  { %507 = vmatpush.msrb.mxu1 %v339_v50  ;;  %548 = vmatpush.msrb.mxu3 %v401_v5  ;;  %v287_v42 = vunpack.c.h.bf16 %v2903_v32  ;;  %v319_v46 = vunpack.c.h.bf16 %v2904_v45  ;;  %v347_v54 = vunpack.c.h.bf16 %v2661_v51  ;;  %v381_v63 = vunpack.c.h.bf16 %v2906_v62  ;;  %v572_v25 = vld [vmem:[%s2852_s4] sm:$0x3]  ;;  %v2776_v41 = vld [vmem:[#allocation5 + $0x38] sm:$0xff]  }
  0x59   :  { %529 = vmatpush.msrb.mxu2 %v367_v10  ;;  %488 = vmatpush.msrb.mxu0 %v305_v11  ;;  %v285_v4 = vunpack.c.h.bf16 %v2907_v19  ;;  %v317_v50 = vunpack.c.h.bf16 %v2909_v20  ;;  %v345_v5 = vunpack.c.h.bf16 %v2673_v13  ;;  %v2910_v10 = vld [vmem:[#allocation59_spill] sm:$0xff]  ;;  %v2911_v11 = vld [vmem:[#allocation60_spill] sm:$0xff]  ;;  %v281_v13 = vunpack.c.h.bf16 %v2679_v0 }
  0x5a   :  { %508 = vmatpush.msrb.mxu1 %v337_v15  ;;  %549 = vmatpush.msrb.mxu3 %v399_v12  ;;  %v379_v51 = vunpack.c.h.bf16 %v2910_v10  ;;  %v283_v15 = vunpack.c.h.bf16 %v2911_v11  ;;  %v2912_v12 = vld [vmem:[#allocation45_spill] sm:$0xff]  ;;  %v574_v32 = vperm.slane %v572_v25, 0 }
  0x5b   :  { %530 = vmatpush.msrb.mxu2 %v365_v1  ;;  %489 = vmatpush.msrb.mxu0 %v303_v16  ;;  %v2913_v1 = vld [vmem:[#allocation61_spill] sm:$0xff] }
  0x5c   :  { %509 = vmatpush.msrb.mxu1 %v335_v17  ;;  %550 = vmatpush.msrb.mxu3 %v397_v22  ;;  %v315_v16 = vunpack.c.h.bf16 %v2913_v1  ;;  %v343_v17 = vunpack.c.h.bf16 %v2685_v2  ;;  %v2914_v22 = vld [vmem:[#allocation46_spill] sm:$0xff]  ;;  %v311_v2 = vunpack.c.h.bf16 %v2695_v59  ;;  %v1980_v1 = vld [vmem:[#allocation3 + $0x10] sm:$0xff]  }
  0x5d   :  { %531 = vmatpush.msrb.mxu2 %v363_v23  ;;  %490 = vmatpush.msrb.mxu0 %v301_v24  ;;  %v377_v23 = vunpack.c.h.bf16 %v2675_v9  ;;  %v2915_v24 = vld [vmem:[#allocation62_spill] sm:$0xff] }
  0x5e   :  { %510 = vmatpush.msrb.mxu1 %v333_v27  ;;  %551 = vmatpush.msrb.mxu3 %v395_v28  ;;  %v313_v27 = vunpack.c.h.bf16 %v2915_v24  ;;  %v375_v28 = vunpack.c.h.bf16 %v2687_v3  ;;  %v1979_v24 = vld [vmem:[#allocation3 + $0x8] sm:$0xff]  }
  0x5f   :  { %532 = vmatpush.msrb.mxu2 %v361_v29  ;;  %491 = vmatpush.msrb.mxu0 %v299_v33  ;;  %v279_v29 = vunpack.c.h.bf16 %v2693_v37 }
  0x60   :  { %511 = vmatpush.msrb.mxu1 %v331_v34  ;;  %552 = vmatpush.msrb.mxu3 %v393_v35 }
  0x61   :  { %533 = vmatpush.msrb.mxu2 %v359_v38  ;;  %492 = vmatpush.msrb.mxu0 %v297_v39 }
  0x62   :  { %512 = vmatpush.msrb.mxu1 %v329_v40  ;;  %553 = vmatpush.msrb.mxu3 %v391_v43 }
  0x63   :  { %534 = vmatpush.msrb.mxu2 %v357_v44  ;;  %493 = vmatpush.msrb.mxu0 %v295_v47 }
  0x64   :  { %513 = vmatpush.msrb.mxu1 %v327_v48  ;;  %554 = vmatpush.msrb.mxu3 %v389_v49  ;;  %v1985_v48 = vld [vmem:[#allocation3 + $0x38] sm:$0xff]  }
  0x65   :  { %535 = vmatpush.msrb.mxu2 %v355_v52  ;;  %494 = vmatpush.msrb.mxu0 %v293_v53  ;;  %v1993_v49 = vld [vmem:[#allocation3 + $0x78] sm:$0xff]   ;;  %v1984_v52 = vld [vmem:[#allocation3 + $0x30] sm:$0xff]   ;;  %v1754_v53 = vunpack.c.h.bf16 %v1985_v48 }
  0x66   :  { %514 = vmatpush.msrb.mxu1 %v325_v56  ;;  %555 = vmatpush.msrb.mxu3 %v387_v57  ;;  %v1753_v56 = vunpack.c.l.bf16 %v1985_v48  ;;  %v1786_v57 = vunpack.c.h.bf16 %v1993_v49  ;;  %v1749_v58 = vunpack.c.l.bf16 %v1984_v52 }
  0x67   :  { %536 = vmatpush.msrb.mxu2 %v353_v60  ;;  %495 = vmatpush.msrb.mxu0 %v291_v61  ;;  %v1992_v60 = vld [vmem:[#allocation3 + $0x70] sm:$0xff]   ;;  %v1785_v61 = vunpack.c.l.bf16 %v1993_v49 }
  0x68   :  { %515 = vmatpush.msrb.mxu1 %v323_v7  ;;  %556 = vmatpush.msrb.mxu3 %v385_v8  ;;  %v1750_v7 = vunpack.c.h.bf16 %v1984_v52  ;;  %v1782_v8 = vunpack.c.h.bf16 %v1992_v60 }
  0x69   :  { %537 = vmatpush.msrb.mxu2 %v351_v21  ;;  %496 = vmatpush.msrb.mxu0 %v289_v18  ;;  %v1991_v21 = vld [vmem:[#allocation3 + $0x68] sm:$0xff]   ;;  %v1781_v18 = vunpack.c.l.bf16 %v1992_v60 }
  0x6a   :  { %462 = vmatmul.f32.vlgmr.msra.gmra.mxu2 %v2905_v55  ;;  %516 = vmatpush.msrb.mxu1 %v321_v26  ;;  %v1982_v26 = vld [vmem:[#allocation3 + $0x20] sm:$0xff]   ;;  %v1778_v30 = vunpack.c.h.bf16 %v1991_v21  ;;  %v1777_v45 = vunpack.c.l.bf16 %v1991_v21 }
  0x6b   :  { %538 = vmatpush.msrb.mxu2 %v349_v31  ;;  %557 = vmatpush.msrb.mxu3 %v383_v36  ;;  %v1746_v31 = vunpack.c.h.bf16 %v1983_v14  ;;  %v1990_v36 = vld [vmem:[#allocation3 + $0x60] sm:$0xff]   ;;  %v1742_v62 = vunpack.c.h.bf16 %v1982_v26 }
  0x6c   :  { %482 = vmatmul.f32.vlgmr.msra.gmra.mxu3 %v2908_v6  ;;  %497 = vmatpush.msrb.mxu0 %v287_v42  ;;  %v1745_v42 = vunpack.c.l.bf16 %v1983_v14 }
  0x6d   :  { %517 = vmatpush.msrb.mxu1 %v319_v46  ;;  %539 = vmatpush.msrb.mxu2 %v347_v54  ;;  %v575_v46 = vperm.slane %v572_v25, 1  ;;  %v1818_v54 = vunpack.c.h.bf16 %v2776_v41 }
  0x6e   :  { %558 = vmatpush.msrb.mxu3 %v381_v63  ;;  %422 = vmatmul.f32.vlgmr.msra.gmra.mxu0 %v2912_v12  ;;  %v1774_v63 = vunpack.c.h.bf16 %v1990_v36 }
  0x6f   :  { %442 = vmatmul.f32.vlgmr.msra.gmra.mxu1 %v2914_v22  ;;  %498 = vmatpush.msrb.mxu0 %v285_v4  ;;  %v1981_v4 = vld [vmem:[#allocation3 + $0x18] sm:$0xff]  }
  0x70   :  { %518 = vmatpush.msrb.mxu1 %v317_v50  ;;  %540 = vmatpush.msrb.mxu2 %v345_v5  ;;  %v1741_v50 = vunpack.c.l.bf16 %v1982_v26  ;;  %v1773_v5 = vunpack.c.l.bf16 %v1990_v36  ;;  %v1738_v11 = vunpack.c.h.bf16 %v1981_v4  ;;  %v1817_v26 = vunpack.c.l.bf16 %v2776_v41 }
  0x71   :  { %559 = vmatpush.msrb.mxu3 %v379_v51  ;;  %499 = vmatpush.msrb.mxu0 %v283_v15 }
  0x72   :  { %519 = vmatpush.msrb.mxu1 %v315_v16  ;;  %541 = vmatpush.msrb.mxu2 %v343_v17  ;;  %v1988_v16 = vld [vmem:[#allocation3 + $0x50] sm:$0xff]   ;;  %v1737_v17 = vunpack.c.l.bf16 %v1981_v4 }
  0x73   :  { %560 = vmatpush.msrb.mxu3 %v377_v23  ;;  %542 = vmatmul.f32.vlgmr.msrb.gmra.mxu2 %v2905_v55  ;;  %v1734_v23 = vunpack.c.h.bf16 %v1980_v1 }
  0x74   :  { %500 = vmatpush.msrb.mxu0 %v281_v13  ;;  %520 = vmatpush.msrb.mxu1 %v313_v27  ;;  %v1766_v13 = vunpack.c.h.bf16 %v1988_v16  ;;  %v1987_v27 = vld [vmem:[#allocation3 + $0x48] sm:$0xff]  }
  0x75   :  { %561 = vmatpush.msrb.mxu3 %v375_v28  ;;  %766 = vmatpush.msra.mxu2 %v1818_v54  ;;  %v1733_v28 = vunpack.c.l.bf16 %v1980_v1 }
  0x76   :  { %562 = vmatmul.f32.vlgmr.msrb.gmra.mxu3 %v2908_v6  ;;  %501 = vmatpush.msrb.mxu0 %v279_v29  ;;  %v1989_v6 = vld [vmem:[#allocation3 + $0x58] sm:$0xff]   ;;  %v1765_v29 = vunpack.c.l.bf16 %v1988_v16 }
  0x77   :  { %521 = vmatpush.msrb.mxu1 %v311_v2  ;;  %502 = vmatmul.f32.vlgmr.msrb.gmra.mxu0 %v2912_v12  ;;  %v1770_v15 = vunpack.c.h.bf16 %v1989_v6 }
  0x78   :  { %522 = vmatmul.f32.vlgmr.msrb.gmra.mxu1 %v2914_v22  ;;  %676 = vmatpush.msra.mxu0 %v1754_v53  ;;  %v1769_v22 = vunpack.c.l.bf16 %v1989_v6  ;;  %v1994_v6 = vld [vmem:[#allocation5 + $0x8] sm:$0xff]  }
  0x79   :  { %696 = vmatpush.msra.mxu1 %v1786_v57  ;;  %767 = vmatpush.msra.mxu2 %v1817_v26 }
  0x7a   :  { %677 = vmatpush.msra.mxu0 %v1753_v56 }
  0x7b   :  { %697 = vmatpush.msra.mxu1 %v1785_v61 }
  0x7c   :  { %678 = vmatpush.msra.mxu0 %v1750_v7 }
  0x7d   :  { %698 = vmatpush.msra.mxu1 %v1782_v8 }
  0x7e   :  { %679 = vmatpush.msra.mxu0 %v1749_v58 }
  0x7f   :  { %699 = vmatpush.msra.mxu1 %v1781_v18 }
  0x80   :  { %680 = vmatpush.msra.mxu0 %v1746_v31  ;;  %v1999_v31 = vld [vmem:[#allocation5 + $0x30] sm:$0xff]  }
  0x81   :  { %700 = vmatpush.msra.mxu1 %v1778_v30  ;;  %v1814_v30 = vunpack.c.h.bf16 %v1999_v31  ;;  %v1813_v36 = vunpack.c.l.bf16 %v1999_v31 }
  0x82   :  { %681 = vmatpush.msra.mxu0 %v1745_v42 }
  0x83   :  { %701 = vmatpush.msra.mxu1 %v1777_v45  ;;  %768 = vmatpush.msra.mxu2 %v1814_v30  ;;  %v2051_v30 = vld [vmem:[%s2852_s4 + $0x3] ss:$0 sm:$0xff] }
  0x84   :  { %682 = vmatpush.msra.mxu0 %v1742_v62  ;;  %v1996_v62 = vld [vmem:[#allocation5 + $0x18] sm:$0xff]  }
  0x85   :  { %702 = vmatpush.msra.mxu1 %v1774_v63  ;;  %769 = vmatpush.msra.mxu2 %v1813_v36  ;;  %v1802_v63 = vunpack.c.h.bf16 %v1996_v62  ;;  %v1801_v41 = vunpack.c.l.bf16 %v1996_v62 }
  0x86   :  { %683 = vmatpush.msra.mxu0 %v1741_v50  ;;  %v1794_v50 = vunpack.c.h.bf16 %v1994_v6 }
  0x87   :  { %703 = vmatpush.msra.mxu1 %v1773_v5  ;;  %v1788_v5 = vld [vmem:[#allocation5] sm:$0xff]  }
  0x88   :  { %684 = vmatpush.msra.mxu0 %v1738_v11  ;;  %v1789_v11 = vunpack.c.l.bf16 %v1788_v5 }
  0x89   :  { %704 = vmatpush.msra.mxu1 %v1770_v15  ;;  %v2050_v15 = vld [vmem:[%s2852_s4 + $0x2] ss:$0 sm:$0xff] }
  0x8a   :  { %685 = vmatpush.msra.mxu0 %v1737_v17 }
  0x8b   :  { %705 = vmatpush.msra.mxu1 %v1769_v22 }
  0x8c   :  { %686 = vmatpush.msra.mxu0 %v1734_v23 }
  0x8d   :  { %706 = vmatpush.msra.mxu1 %v1766_v13 }
  0x8e   :  { %687 = vmatpush.msra.mxu0 %v1733_v28 }
  0x8f   :  { %707 = vmatpush.msra.mxu1 %v1765_v29 }
  0xeb   :  { %v423_v0 = vpop.f32.mrf.mxu0 }
  0xec   :  { %v443_v3 = vpop.f32.mrf.mxu1 }
  0xed   :  { %v444_v9 = vadd.f32 %v443_v3, %v423_v0  ;;  %v463_v37 = vpop.f32.mrf.mxu2  ;;  %v1730_v3 = vunpack.c.h.bf16 %v1979_v24 }
  0xef   :  { %v464_v33 = vadd.f32 %v463_v37, %v444_v9  ;;  %v483_v34 = vpop.f32.mrf.mxu3  ;;  %v1762_v9 = vunpack.c.h.bf16 %v1987_v27  ;;  %688 = vmatpush.msra.mxu0 %v1730_v3 }
  0xf1   :  { %v484_v35 = vadd.f32 %v483_v34, %v464_v33  ;;  %v1724_v34 = vld [vmem:[#allocation3] sm:$0xff]   ;;  %708 = vmatpush.msra.mxu1 %v1762_v9 }
  0xf2   :  { %v1725_v53 = vunpack.c.l.bf16 %v1724_v34 }
  0xf3   :  { %v2779_v55 = vadd.f32 %v574_v32, %v484_v35  ;;  %v1986_v35 = vld [vmem:[#allocation3 + $0x40] sm:$0xff]   ;;  %v1998_v32 = vld [vmem:[#allocation5 + $0x28] sm:$0xff]  }
  0xf4   :  { %v503_v38 = vpop.f32.mrf.mxu0  ;;  %v1757_v56 = vunpack.c.l.bf16 %v1986_v35  ;;  %v1810_v42 = vunpack.c.h.bf16 %v1998_v32  ;;  %v1809_v45 = vunpack.c.l.bf16 %v1998_v32 }
  0xf5   :  { %v523_v59 = vpop.f32.mrf.mxu1  ;;  %v582_v20 = vmin.f32 %v2779_v55, 20.0  ;;  %vm580_vm1 = vcmp.gt.f32.partialorder %v2779_v55, 20.0 }
  0xf6   :  { %v524_v39 = vadd.f32 %v523_v59, %v503_v38  ;;  %v543_v40 = vpop.f32.mrf.mxu2  ;;  %770 = vmatpush.msra.mxu2 %v1810_v42 }
  0xf7   :  { %v584_v51 = vmul.f32 1.442695, %v582_v20 }
  0xf8   :  { %v544_v43 = vadd.f32 %v543_v40, %v524_v39  ;;  %v1729_v39 = vunpack.c.l.bf16 %v1979_v24  ;;  %v1761_v40 = vunpack.c.l.bf16 %v1987_v27  ;;  %771 = vmatpush.msra.mxu2 %v1809_v45 }
  0xf9   :  { %v563_v44 = vpop.f32.mrf.mxu3  ;;  %2057 = vpow2.f32 %v584_v51  ;;  %v1790_v51 = vunpack.c.h.bf16 %v1788_v5 }
  0xfa   :  { %v564_v47 = vadd.f32 %v563_v44, %v544_v43  ;;  %v1726_v44 = vunpack.c.h.bf16 %v1724_v34  ;;  %689 = vmatpush.msra.mxu0 %v1729_v39  ;;  %709 = vmatpush.msra.mxu1 %v1761_v40  ;;  %v2005_v40 = vld [vmem:[#allocation7 + $0x28] sm:$0xff]  }
  0xfc   :  { %v2781_v19 = vadd.f32 %v575_v46, %v564_v47  ;;  %v1758_v47 = vunpack.c.h.bf16 %v1986_v35  ;;  %690 = vmatpush.msra.mxu0 %v1726_v44  ;;  %v1997_v46 = vld [vmem:[#allocation5 + $0x20] sm:$0xff]   ;;  %v1841_v44 = vunpack.c.l.bf16 %v2005_v40 }
  0xfd   :  { %v1806_v54 = vunpack.c.h.bf16 %v1997_v46 }
  0xfe   :  { %v583_v10 = vmin.f32 %v2781_v19, 20.0  ;;  %710 = vmatpush.msra.mxu1 %v1758_v47  ;;  %691 = vmatpush.msra.mxu0 %v1725_v53  ;;  %vm581_vm3 = vcmp.gt.f32.partialorder %v2781_v19, 20.0  ;;  %v2004_v47 = vld [vmem:[#allocation7 + $0x20] sm:$0xff]  }
  0xff   :  { %v2058_v2 = vpop.eup %2057  ;;  %772 = vmatpush.msra.mxu2 %v1806_v54 }
 0x100   :  { %v586_v12 = vmul.f32 1.442695, %v583_v10  ;;  %v588_v37 = vadd.f32 1.0, %v2058_v2  ;;  %v591_v33 = vmul.f32 -0.5, %v2058_v2  ;;  %v594_v48 = vand.u32 2147483647, %v2058_v2  ;;  %711 = vmatpush.msra.mxu1 %v1757_v56 }
 0x101   :  { %v1793_v10 = vunpack.c.l.bf16 %v1994_v6  ;;  %v2002_v56 = vld [vmem:[#allocation7 + $0x10] sm:$0xff]  }
 0x102   :  { %2059 = vpow2.f32 %v586_v12  ;;  %v592_v43 = vadd.f32 1.0, %v591_v33  ;;  %vm595_vm0 = vcmp.lt.f32.partialorder %v594_v48, 0.0004427343  ;;  %v2007_v12 = vld [vmem:[#allocation7 + $0x38] sm:$0xff]   ;;  %v1838_v48 = vunpack.c.h.bf16 %v2004_v47 }
 0x103   :  { %2061 = vlog2.f32 %v588_v37  ;;  %v1850_v1 = vunpack.c.h.bf16 %v2007_v12  ;;  %v1849_v16 = vunpack.c.l.bf16 %v2007_v12  ;;  %v2011_v12 = vld [vmem:[#allocation8 + $0x20] sm:$0xff]  }
 0x104   :  { %v593_v57 = vmul.f32 %v2058_v2, %v592_v43  ;;  %v1842_v43 = vunpack.c.h.bf16 %v2005_v40 }
 0x105   :  { %836 = vmatpush.msra.mxu3 %v1850_v1  ;;  %v1870_v1 = vunpack.c.h.bf16 %v2011_v12 }
 0x107   :  { %837 = vmatpush.msra.mxu3 %v1849_v16  ;;  %v1869_v16 = vunpack.c.l.bf16 %v2011_v12 }
 0x108   :  { %v2060_v0 = vpop.eup %2059 }
 0x109   :  { %v597_v38 = vadd.f32 1.0, %v2060_v0  ;;  %v600_v59 = vmul.f32 -0.5, %v2060_v0  ;;  %v603_v52 = vand.u32 2147483647, %v2060_v0  ;;  %v2062_v60 = vpop.eup %2061 }
 0x10a   :  { %v590_v8 = vmul.f32 0.6931472, %v2062_v60  ;;  %v1830_v60 = vunpack.c.h.bf16 %v2002_v56 }
 0x10b   :  { %2063 = vlog2.f32 %v597_v38  ;;  %v601_v49 = vadd.f32 1.0, %v600_v59  ;;  %vm604_vm2 = vcmp.lt.f32.partialorder %v603_v52, 0.0004427343  ;;  %v2006_v38 = vld [vmem:[#allocation7 + $0x30] sm:$0xff]   ;;  %v2003_v52 = vld [vmem:[#allocation7 + $0x18] sm:$0xff]  }
 0x10c   :  { %v596_v21 = vsel %vm595_vm0, %v593_v57, %v590_v8  ;;  %v1846_v59 = vunpack.c.h.bf16 %v2006_v38  ;;  %v1845_v39 = vunpack.c.l.bf16 %v2006_v38  ;;  %v1834_v53 = vunpack.c.h.bf16 %v2003_v52  ;;  %v2052_v38 = vld [vmem:[%s2852_s4 + $0x4] ss:$0 sm:$0xff] }
 0x10d   :  { %v602_v61 = vmul.f32 %v2060_v0, %v601_v49  ;;  %v606_v58 = vsel %vm580_vm1, %v2779_v55, %v596_v21  ;;  %v1805_v55 = vunpack.c.l.bf16 %v1997_v46  ;;  %v1837_v49 = vunpack.c.l.bf16 %v2004_v47 }
 0x10e   :  { %692 = vmatmul.f32.vlgmr.msra.gmra.mxu0 %v606_v58  ;;  %838 = vmatpush.msra.mxu3 %v1846_v59  ;;  %v1833_v57 = vunpack.c.l.bf16 %v2003_v52 }
 0x10f   :  { %773 = vmatpush.msra.mxu2 %v1805_v55 }
 0x110   :  { %839 = vmatpush.msra.mxu3 %v1845_v39  ;;  %v2019_v39 = vld [vmem:[#allocation10 + $0x28] sm:$0xff]  }
 0x111   :  { %v2064_v7 = vpop.eup %2063  ;;  %774 = vmatpush.msra.mxu2 %v1802_v63  ;;  %v1906_v47 = vunpack.c.h.bf16 %v2019_v39  ;;  %v1905_v52 = vunpack.c.l.bf16 %v2019_v39 }
 0x112   :  { %v599_v14 = vmul.f32 0.6931472, %v2064_v7  ;;  %840 = vmatpush.msra.mxu3 %v1842_v43  ;;  %v1829_v7 = vunpack.c.l.bf16 %v2002_v56 }
 0x113   :  { %775 = vmatpush.msra.mxu2 %v1801_v41 }
 0x114   :  { %v605_v18 = vsel %vm604_vm2, %v602_v61, %v599_v14  ;;  %841 = vmatpush.msra.mxu3 %v1841_v44  ;;  %v2001_v61 = vld [vmem:[#allocation7 + $0x8] sm:$0xff]   ;;  %v1820_v14 = vld [vmem:[#allocation7] sm:$0xff]  }
 0x115   :  { %v607_v25 = vsel %vm581_vm3, %v2781_v19, %v605_v18  ;;  %v1995_v19 = vld [vmem:[#allocation5 + $0x10] sm:$0xff]   ;;  %v1826_v8 = vunpack.c.h.bf16 %v2001_v61  ;;  %v1825_v21 = vunpack.c.l.bf16 %v2001_v61  ;;  %v1822_v58 = vunpack.c.h.bf16 %v1820_v14 }
 0x116   :  { %712 = vmatmul.f32.vlgmr.msra.gmra.mxu1 %v607_v25  ;;  %v1798_v4 = vunpack.c.h.bf16 %v1995_v19  ;;  %v1797_v20 = vunpack.c.l.bf16 %v1995_v19  ;;  %842 = vmatpush.msra.mxu3 %v1838_v48  ;;  %v1821_v18 = vunpack.c.l.bf16 %v1820_v14  ;;  %v2014_v25 = vld [vmem:[#allocation8 + $0x38] sm:$0xff]  }
 0x117   :  { %v1882_v26 = vunpack.c.h.bf16 %v2014_v25  ;;  %v1881_v31 = vunpack.c.l.bf16 %v2014_v25  ;;  %v2015_v25 = vld [vmem:[#allocation10 + $0x8] sm:$0xff]  }
 0x118   :  { %776 = vmatpush.msra.mxu2 %v1798_v4  ;;  %843 = vmatpush.msra.mxu3 %v1837_v49  ;;  %v2018_v49 = vld [vmem:[#allocation10 + $0x20] sm:$0xff]  }
 0x119   :  { %906 = vmatpush.msrb.mxu0 %v1882_v26  ;;  %v1902_v56 = vunpack.c.h.bf16 %v2018_v49 }
 0x11a   :  { %777 = vmatpush.msra.mxu2 %v1797_v20  ;;  %844 = vmatpush.msra.mxu3 %v1834_v53 }
 0x11b   :  { %907 = vmatpush.msrb.mxu0 %v1881_v31  ;;  %v1890_v31 = vunpack.c.h.bf16 %v2015_v25 }
 0x11c   :  { %778 = vmatpush.msra.mxu2 %v1794_v50  ;;  %845 = vmatpush.msra.mxu3 %v1833_v57  ;;  %v2013_v50 = vld [vmem:[#allocation8 + $0x30] sm:$0xff]   ;;  %v2017_v57 = vld [vmem:[#allocation10 + $0x18] sm:$0xff]  }
 0x11d   :  { %v1878_v5 = vunpack.c.h.bf16 %v2013_v50  ;;  %v1898_v61 = vunpack.c.h.bf16 %v2017_v57 }
 0x11e   :  { %779 = vmatpush.msra.mxu2 %v1793_v10  ;;  %846 = vmatpush.msra.mxu3 %v1830_v60  ;;  %v1877_v10 = vunpack.c.l.bf16 %v2013_v50  ;;  %v1901_v60 = vunpack.c.l.bf16 %v2018_v49 }
 0x11f   :  { %908 = vmatpush.msrb.mxu0 %v1878_v5 }
 0x120   :  { %780 = vmatpush.msra.mxu2 %v1790_v51  ;;  %847 = vmatpush.msra.mxu3 %v1829_v7  ;;  %v2012_v51 = vld [vmem:[#allocation8 + $0x28] sm:$0xff]   ;;  %v2016_v7 = vld [vmem:[#allocation10 + $0x10] sm:$0xff]  }
 0x121   :  { %909 = vmatpush.msrb.mxu0 %v1877_v10  ;;  %v1893_v26 = vunpack.c.l.bf16 %v2016_v7  ;;  %v2027_v10 = vld [vmem:[#allocation11 + $0x30] sm:$0xff]  }
 0x122   :  { %781 = vmatpush.msra.mxu2 %v1789_v11  ;;  %848 = vmatpush.msra.mxu3 %v1826_v8  ;;  %v1874_v11 = vunpack.c.h.bf16 %v2012_v51  ;;  %v1897_v8 = vunpack.c.l.bf16 %v2017_v57 }
 0x124   :  { %849 = vmatpush.msra.mxu3 %v1825_v21  ;;  %910 = vmatpush.msrb.mxu0 %v1874_v11  ;;  %v1941_v11 = vunpack.c.l.bf16 %v2027_v10 }
 0x126   :  { %850 = vmatpush.msra.mxu3 %v1822_v58  ;;  %v1894_v58 = vunpack.c.h.bf16 %v2016_v7 }
 0x128   :  { %851 = vmatpush.msra.mxu3 %v1821_v18 }
 0x18b   :  { %v693_v17 = vpop.f32.mrf.mxu0 }
 0x18c   :  { %v694_v22 = vadd.f32 %v2050_v15, %v693_v17  ;;  %v1873_v15 = vunpack.c.l.bf16 %v2012_v51  ;;  %v2010_v17 = vld [vmem:[#allocation8 + $0x18] sm:$0xff]   ;;  %v1942_v51 = vunpack.c.h.bf16 %v2027_v10 }
 0x18e   :  { %911 = vmatpush.msrb.mxu0 %v1873_v15  ;;  %v2026_v15 = vld [vmem:[#allocation11 + $0x28] sm:$0xff]  }
 0x18f   :  { %v1938_v12 = vunpack.c.h.bf16 %v2026_v15 }
 0x190   :  { %912 = vmatpush.msrb.mxu0 %v1870_v1  ;;  %v1937_v1 = vunpack.c.l.bf16 %v2026_v15 }
 0x192   :  { %913 = vmatpush.msrb.mxu0 %v1869_v16  ;;  %v2025_v16 = vld [vmem:[#allocation11 + $0x20] sm:$0xff]  }
 0x193   :  { %v713_v23 = vpop.f32.mrf.mxu1 }
 0x194   :  { %v714_v13 = vadd.f32 %v713_v23, %v694_v22  ;;  %v1866_v22 = vunpack.c.h.bf16 %v2010_v17  ;;  %v2009_v23 = vld [vmem:[#allocation8 + $0x10] sm:$0xff]  }
 0x196   :  { %v717_v24 = vmin.f32 %v714_v13, 20.0  ;;  %vm716_vm5 = vcmp.gt.f32.partialorder %v714_v13, 20.0  ;;  %914 = vmatpush.msrb.mxu0 %v1866_v22  ;;  %v1933_v22 = vunpack.c.l.bf16 %v2025_v16 }
 0x198   :  { %v718_v27 = vmul.f32 1.442695, %v717_v24  ;;  %v1862_v24 = vunpack.c.h.bf16 %v2009_v23 }
 0x19a   :  { %2065 = vpow2.f32 %v718_v27  ;;  %v2008_v27 = vld [vmem:[#allocation8 + $0x8] sm:$0xff]  }
 0x1a0   :  { %v2066_v28 = vpop.eup %2065 }
 0x1a1   :  { %v720_v29 = vadd.f32 1.0, %v2066_v28  ;;  %v723_v2 = vmul.f32 -0.5, %v2066_v28  ;;  %v726_v3 = vand.u32 2147483647, %v2066_v28 }
 0x1a3   :  { %2067 = vlog2.f32 %v720_v29  ;;  %v724_v0 = vadd.f32 1.0, %v723_v2  ;;  %vm727_vm4 = vcmp.lt.f32.partialorder %v726_v3, 0.0004427343  ;;  %v1858_v29 = vunpack.c.h.bf16 %v2008_v27  ;;  %v1852_v2 = vld [vmem:[#allocation8] sm:$0xff]  }
 0x1a4   :  { %v1854_v3 = vunpack.c.h.bf16 %v1852_v2 }
 0x1a5   :  { %v725_v33 = vmul.f32 %v2066_v28, %v724_v0  ;;  %v1861_v28 = vunpack.c.l.bf16 %v2009_v23  ;;  %v1857_v0 = vunpack.c.l.bf16 %v2008_v27  ;;  %v2024_v23 = vld [vmem:[#allocation11 + $0x18] sm:$0xff]  }
 0x1a6   :  { %v1929_v27 = vunpack.c.l.bf16 %v2024_v23 }
 0x1a9   :  { %v2068_v9 = vpop.eup %2067 }
 0x1aa   :  { %v722_v37 = vmul.f32 0.6931472, %v2068_v9  ;;  %v1853_v9 = vunpack.c.l.bf16 %v1852_v2 }
 0x1ac   :  { %v728_v34 = vsel %vm727_vm4, %v725_v33, %v722_v37  ;;  %v2021_v37 = vld [vmem:[#allocation10 + $0x38] sm:$0xff]   ;;  %v2020_v33 = vld [vmem:[#allocation10 + $0x30] sm:$0xff]  }
 0x1ad   :  { %v729_v35 = vsel %vm716_vm5, %v714_v13, %v728_v34  ;;  %v1865_v13 = vunpack.c.l.bf16 %v2010_v17  ;;  %v1914_v34 = vunpack.c.h.bf16 %v2021_v37  ;;  %v1910_v59 = vunpack.c.h.bf16 %v2020_v33 }
 0x1ae   :  { %782 = vmatmul.f32.vlgmr.msra.gmra.mxu2 %v729_v35  ;;  %v1913_v35 = vunpack.c.l.bf16 %v2021_v37  ;;  %v1909_v43 = vunpack.c.l.bf16 %v2020_v33  ;;  %v1934_v17 = vunpack.c.h.bf16 %v2025_v16 }
 0x1af   :  { %915 = vmatpush.msrb.mxu0 %v1865_v13  ;;  %962 = vmatpush.msrb.mxu1 %v1914_v34  ;;  %v1930_v13 = vunpack.c.h.bf16 %v2024_v23  ;;  %v2035_v34 = vld [vmem:[#allocation13 + $0x38] sm:$0xff]  }
 0x1b1   :  { %916 = vmatpush.msrb.mxu0 %v1862_v24  ;;  %963 = vmatpush.msrb.mxu1 %v1913_v35  ;;  %v2023_v24 = vld [vmem:[#allocation11 + $0x10] sm:$0xff]   ;;  %v1978_v35 = vunpack.c.h.bf16 %v2035_v34 }
 0x1b2   :  { %v1925_v2 = vunpack.c.l.bf16 %v2023_v24 }
 0x1b3   :  { %917 = vmatpush.msrb.mxu0 %v1861_v28  ;;  %964 = vmatpush.msrb.mxu1 %v1910_v59  ;;  %v1926_v28 = vunpack.c.h.bf16 %v2023_v24  ;;  %v2054_v59 = vld [vmem:[%s2852_s4 + $0x6] ss:$0 sm:$0xff] }
 0x1b4   :  { %1102 = vmatpush.msrb.mxu3 %v1978_v35 }
 0x1b5   :  { %918 = vmatpush.msrb.mxu0 %v1858_v29  ;;  %965 = vmatpush.msrb.mxu1 %v1909_v43  ;;  %v2022_v29 = vld [vmem:[#allocation11 + $0x8] sm:$0xff]  }
 0x1b7   :  { %919 = vmatpush.msrb.mxu0 %v1857_v0  ;;  %966 = vmatpush.msrb.mxu1 %v1906_v47  ;;  %v1922_v0 = vunpack.c.h.bf16 %v2022_v29 }
 0x1b9   :  { %920 = vmatpush.msrb.mxu0 %v1854_v3  ;;  %967 = vmatpush.msrb.mxu1 %v1905_v52  ;;  %v1916_v3 = vld [vmem:[#allocation11] sm:$0xff]  }
 0x1ba   :  { %v1918_v37 = vunpack.c.h.bf16 %v1916_v3  ;;  %v1917_v33 = vunpack.c.l.bf16 %v1916_v3  ;;  %v1149_v3 = vld [vmem:[#allocation14 + $0x68] sm:$0xff] }
 0x1bb   :  { %921 = vmatpush.msrb.mxu0 %v1853_v9  ;;  %968 = vmatpush.msrb.mxu1 %v1902_v56  ;;  %v1921_v9 = vunpack.c.l.bf16 %v2022_v29 }
 0x1bd   :  { %969 = vmatpush.msrb.mxu1 %v1901_v60 }
 0x1bf   :  { %970 = vmatpush.msrb.mxu1 %v1898_v61 }
 0x1c1   :  { %971 = vmatpush.msrb.mxu1 %v1897_v8  ;;  %v2034_v8 = vld [vmem:[#allocation13 + $0x30] sm:$0xff]  }
 0x1c3   :  { %972 = vmatpush.msrb.mxu1 %v1894_v58  ;;  %v2033_v58 = vld [vmem:[#allocation13 + $0x28] sm:$0xff]  }
 0x1c5   :  { %973 = vmatpush.msrb.mxu1 %v1893_v26  ;;  %v2032_v26 = vld [vmem:[#allocation13 + $0x20] sm:$0xff]  }
 0x1c7   :  { %974 = vmatpush.msrb.mxu1 %v1890_v31  ;;  %v1966_v31 = vunpack.c.h.bf16 %v2032_v26 }
 0x231   :  { %v783_v36 = vpop.f32.mrf.mxu2 }
 0x232   :  { %v784_v32 = vadd.f32 %v2051_v30, %v783_v36 }
 0x234   :  { %v787_v42 = vmin.f32 %v784_v32, 20.0  ;;  %vm786_vm7 = vcmp.gt.f32.partialorder %v784_v32, 20.0 }
 0x236   :  { %v788_v45 = vmul.f32 1.442695, %v787_v42 }
 0x238   :  { %2069 = vpow2.f32 %v788_v45 }
 0x23e   :  { %v2070_v46 = vpop.eup %2069 }
 0x23f   :  { %v790_v54 = vadd.f32 1.0, %v2070_v46  ;;  %v793_v55 = vmul.f32 -0.5, %v2070_v46  ;;  %v796_v63 = vand.u32 2147483647, %v2070_v46 }
 0x241   :  { %2071 = vlog2.f32 %v790_v54  ;;  %v794_v62 = vadd.f32 1.0, %v793_v55  ;;  %vm797_vm6 = vcmp.lt.f32.partialorder %v796_v63, 0.0004427343 }
 0x243   :  { %v795_v4 = vmul.f32 %v2070_v46, %v794_v62  ;;  %v1884_v62 = vld [vmem:[#allocation10] sm:$0xff]  }
 0x244   :  { %v1886_v63 = vunpack.c.h.bf16 %v1884_v62 }
 0x247   :  { %v2072_v19 = vpop.eup %2071 }
 0x248   :  { %v792_v41 = vmul.f32 0.6931472, %v2072_v19  ;;  %v1885_v19 = vunpack.c.l.bf16 %v1884_v62 }
 0x24a   :  { %v798_v6 = vsel %vm797_vm6, %v795_v4, %v792_v41  ;;  %v2028_v41 = vld [vmem:[#allocation11 + $0x38] sm:$0xff]  }
 0x24b   :  { %v799_v20 = vsel %vm786_vm7, %v784_v32, %v798_v6  ;;  %v1889_v32 = vunpack.c.l.bf16 %v2015_v25  ;;  %v1946_v4 = vunpack.c.h.bf16 %v2028_v41  ;;  %v1945_v6 = vunpack.c.l.bf16 %v2028_v41 }
 0x24c   :  { %852 = vmatmul.f32.vlgmr.msra.gmra.mxu3 %v799_v20  ;;  %v2053_v20 = vld [vmem:[%s2852_s4 + $0x5] ss:$0 sm:$0xff]  ;;  %v1969_v25 = vunpack.c.l.bf16 %v2033_v58 }
 0x24d   :  { %975 = vmatpush.msrb.mxu1 %v1889_v32  ;;  %1032 = vmatpush.msrb.mxu2 %v1946_v4 }
 0x24f   :  { %976 = vmatpush.msrb.mxu1 %v1886_v63  ;;  %1033 = vmatpush.msrb.mxu2 %v1945_v6  ;;  %v1948_v63 = vld [vmem:[#allocation13] sm:$0xff]   ;;  %v1151_v6 = vld [vmem:[#allocation14 + $0x78] sm:$0xff] }
 0x250   :  { %v1950_v41 = vunpack.c.h.bf16 %v1948_v63  ;;  %v1949_v4 = vunpack.c.l.bf16 %v1948_v63 }
 0x251   :  { %977 = vmatpush.msrb.mxu1 %v1885_v19  ;;  %1034 = vmatpush.msrb.mxu2 %v1942_v51 }
 0x253   :  { %1035 = vmatpush.msrb.mxu2 %v1941_v11  ;;  %v2055_v11 = vld [vmem:[%s2852_s4 + $0x7] ss:$0 sm:$0xff] }
 0x255   :  { %1036 = vmatpush.msrb.mxu2 %v1938_v12 }
 0x257   :  { %1037 = vmatpush.msrb.mxu2 %v1937_v1 }
 0x259   :  { %1038 = vmatpush.msrb.mxu2 %v1934_v17 }
 0x25b   :  { %1039 = vmatpush.msrb.mxu2 %v1933_v22 }
 0x25d   :  { %1040 = vmatpush.msrb.mxu2 %v1930_v13 }
 0x25f   :  { %1041 = vmatpush.msrb.mxu2 %v1929_v27 }
 0x261   :  { %1042 = vmatpush.msrb.mxu2 %v1926_v28 }
 0x263   :  { %1043 = vmatpush.msrb.mxu2 %v1925_v2 }
 0x265   :  { %1044 = vmatpush.msrb.mxu2 %v1922_v0 }
 0x267   :  { %1045 = vmatpush.msrb.mxu2 %v1921_v9  ;;  %v1178_v9 = vunpack.c.l.bf16 %v1149_v3 }
 0x269   :  { %1046 = vmatpush.msrb.mxu2 %v1918_v37  ;;  %v1179_v37 = vunpack.c.h.bf16 %v1149_v3 }
 0x26b   :  { %1047 = vmatpush.msrb.mxu2 %v1917_v33  ;;  %v1148_v33 = vld [vmem:[#allocation14 + $0x60] sm:$0xff] }
 0x26c   :  { %v1177_v35 = vunpack.c.h.bf16 %v1148_v33 }
 0x2cf   :  { %v853_v40 = vpop.f32.mrf.mxu3 }
 0x2d0   :  { %v854_v44 = vadd.f32 %v2052_v38, %v853_v40  ;;  %v1977_v38 = vunpack.c.l.bf16 %v2035_v34  ;;  %v1176_v34 = vunpack.c.l.bf16 %v1148_v33 }
 0x2d2   :  { %v857_v48 = vmin.f32 %v854_v44, 20.0  ;;  %vm856_vm9 = vcmp.gt.f32.partialorder %v854_v44, 20.0  ;;  %1103 = vmatpush.msrb.mxu3 %v1977_v38  ;;  %v1147_v38 = vld [vmem:[#allocation14 + $0x58] sm:$0xff] }
 0x2d4   :  { %v858_v53 = vmul.f32 1.442695, %v857_v48 }
 0x2d6   :  { %2073 = vpow2.f32 %v858_v53 }
 0x2dc   :  { %v2074_v14 = vpop.eup %2073 }
 0x2dd   :  { %v860_v21 = vadd.f32 1.0, %v2074_v14  ;;  %v863_v18 = vmul.f32 -0.5, %v2074_v14  ;;  %v866_v36 = vand.u32 2147483647, %v2074_v14 }
 0x2df   :  { %2075 = vlog2.f32 %v860_v21  ;;  %v864_v30 = vadd.f32 1.0, %v863_v18  ;;  %vm867_vm8 = vcmp.lt.f32.partialorder %v866_v36, 0.0004427343  ;;  %v1973_v21 = vunpack.c.l.bf16 %v2034_v8  ;;  %v2031_v36 = vld [vmem:[#allocation13 + $0x18] sm:$0xff]  }
 0x2e0   :  { %v1970_v18 = vunpack.c.h.bf16 %v2033_v58  ;;  %v1962_v32 = vunpack.c.h.bf16 %v2031_v36  ;;  %v1140_v58 = vld [vmem:[#allocation14 + $0x20] sm:$0xff] }
 0x2e1   :  { %v865_v46 = vmul.f32 %v2074_v14, %v864_v30  ;;  %v1974_v14 = vunpack.c.h.bf16 %v2034_v8  ;;  %v1965_v30 = vunpack.c.l.bf16 %v2032_v26  ;;  %v1141_v8 = vld [vmem:[#allocation14 + $0x28] sm:$0xff]  ;;  %v1139_v26 = vld [vmem:[#allocation14 + $0x18] sm:$0xff] }
 0x2e3   :  { %1104 = vmatpush.msrb.mxu3 %v1974_v14 }
 0x2e5   :  { %v2076_v42 = vpop.eup %2075  ;;  %1105 = vmatpush.msrb.mxu3 %v1973_v21 }
 0x2e6   :  { %v862_v45 = vmul.f32 0.6931472, %v2076_v42  ;;  %v2030_v42 = vld [vmem:[#allocation13 + $0x10] sm:$0xff]  }
 0x2e7   :  { %1106 = vmatpush.msrb.mxu3 %v1970_v18  ;;  %v1162_v18 = vunpack.c.l.bf16 %v1141_v8 }
 0x2e8   :  { %v868_v54 = vsel %vm867_vm8, %v865_v46, %v862_v45  ;;  %v1961_v45 = vunpack.c.l.bf16 %v2031_v36  ;;  %v1958_v46 = vunpack.c.h.bf16 %v2030_v42  ;;  %v1138_v36 = vld [vmem:[#allocation14 + $0x10] sm:$0xff] }
 0x2e9   :  { %v869_v55 = vsel %vm856_vm9, %v854_v44, %v868_v54  ;;  %1107 = vmatpush.msrb.mxu3 %v1969_v25  ;;  %v2029_v54 = vld [vmem:[#allocation13 + $0x8] sm:$0xff]   ;;  %v1163_v25 = vunpack.c.h.bf16 %v1141_v8 }
 0x2ea   :  { %922 = vmatmul.f32.vlgmr.msrb.gmra.mxu0 %v869_v55  ;;  %v1957_v55 = vunpack.c.l.bf16 %v2030_v42  ;;  %v1954_v62 = vunpack.c.h.bf16 %v2029_v54  ;;  %v1953_v19 = vunpack.c.l.bf16 %v2029_v54  ;;  %v1159_v42 = vunpack.c.h.bf16 %v1139_v26 }
 0x2eb   :  { %1108 = vmatpush.msrb.mxu3 %v1966_v31  ;;  %v1160_v31 = vunpack.c.l.bf16 %v1140_v58  ;;  %v1157_v54 = vunpack.c.h.bf16 %v1138_v36 }
 0x2ed   :  { %1109 = vmatpush.msrb.mxu3 %v1965_v30  ;;  %v1161_v30 = vunpack.c.h.bf16 %v1140_v58 }
 0x2ef   :  { %1110 = vmatpush.msrb.mxu3 %v1962_v32  ;;  %v1158_v32 = vunpack.c.l.bf16 %v1139_v26 }
 0x2f1   :  { %1111 = vmatpush.msrb.mxu3 %v1961_v45  ;;  %v1137_v45 = vld [vmem:[#allocation14 + $0x8] sm:$0xff] }
 0x2f2   :  { %v1155_v63 = vunpack.c.h.bf16 %v1137_v45 }
 0x2f3   :  { %1112 = vmatpush.msrb.mxu3 %v1958_v46  ;;  %v1156_v46 = vunpack.c.l.bf16 %v1138_v36 }
 0x2f5   :  { %1113 = vmatpush.msrb.mxu3 %v1957_v55  ;;  %v1136_v55 = vld [vmem:[#allocation14] sm:$0xff] }
 0x2f7   :  { %1114 = vmatpush.msrb.mxu3 %v1954_v62  ;;  %v1154_v62 = vunpack.c.l.bf16 %v1137_v45 }
 0x2f9   :  { %1115 = vmatpush.msrb.mxu3 %v1953_v19  ;;  %v1152_v19 = vunpack.c.l.bf16 %v1136_v55 }
 0x2fb   :  { %1116 = vmatpush.msrb.mxu3 %v1950_v41  ;;  %v1153_v41 = vunpack.c.h.bf16 %v1136_v55 }
 0x2fd   :  { %1117 = vmatpush.msrb.mxu3 %v1949_v4  ;;  %v2056_v4 = vld [vmem:[%s2852_s4 + $0x8] ss:$0 sm:$0xff] }
 0x367   :  { %v923_v50 = vpop.f32.mrf.mxu0 }
 0x368   :  { %v924_v5 = vadd.f32 %v2053_v20, %v923_v50  ;;  %v1150_v20 = vld [vmem:[#allocation14 + $0x70] sm:$0xff]  ;;  %v1182_v50 = vunpack.c.l.bf16 %v1151_v6 }
 0x369   :  { %v1180_v10 = vunpack.c.l.bf16 %v1150_v20  ;;  %v1181_v51 = vunpack.c.h.bf16 %v1150_v20 }
 0x36a   :  { %978 = vmatmul.f32.vlgmr.msrb.gmra.mxu1 %v924_v5  ;;  %v1183_v5 = vunpack.c.h.bf16 %v1151_v6  ;;  %1190 = vmatpush.msra.mxu0 %v1182_v50 }
 0x36c   :  { %1210 = vmatpush.msra.mxu1 %v1183_v5  ;;  %1191 = vmatpush.msra.mxu0 %v1180_v10 }
 0x36e   :  { %1211 = vmatpush.msra.mxu1 %v1181_v51  ;;  %1192 = vmatpush.msra.mxu0 %v1178_v9 }
 0x370   :  { %1212 = vmatpush.msra.mxu1 %v1179_v37  ;;  %1193 = vmatpush.msra.mxu0 %v1176_v34 }
 0x372   :  { %1213 = vmatpush.msra.mxu1 %v1177_v35 }
 0x3e7   :  { %v979_v39 = vpop.f32.mrf.mxu1 }
 0x3e8   :  { %v980_v40 = vadd.f32 %v2054_v59, %v979_v39  ;;  %v1174_v59 = vunpack.c.l.bf16 %v1147_v38  ;;  %v1175_v39 = vunpack.c.h.bf16 %v1147_v38 }
 0x3ea   :  { %v983_v43 = vmin.f32 %v980_v40, 20.0  ;;  %vm982_vm11 = vcmp.gt.f32.partialorder %v980_v40, 20.0  ;;  %1194 = vmatpush.msra.mxu0 %v1174_v59  ;;  %1214 = vmatpush.msra.mxu1 %v1175_v39 }
 0x3ec   :  { %v984_v44 = vmul.f32 1.442695, %v983_v43 }
 0x3ee   :  { %2077 = vpow2.f32 %v984_v44 }
 0x3f4   :  { %v2078_v47 = vpop.eup %2077 }
 0x3f5   :  { %v986_v48 = vadd.f32 1.0, %v2078_v47  ;;  %v989_v49 = vmul.f32 -0.5, %v2078_v47  ;;  %v992_v53 = vand.u32 2147483647, %v2078_v47 }
 0x3f7   :  { %2079 = vlog2.f32 %v986_v48  ;;  %v990_v52 = vadd.f32 1.0, %v989_v49  ;;  %vm993_vm10 = vcmp.lt.f32.partialorder %v992_v53, 0.0004427343  ;;  %v1143_v53 = vld [vmem:[#allocation14 + $0x38] sm:$0xff] }
 0x3f9   :  { %v991_v60 = vmul.f32 %v2078_v47, %v990_v52  ;;  %v1145_v47 = vld [vmem:[#allocation14 + $0x48] sm:$0xff]  ;;  %v1144_v52 = vld [vmem:[#allocation14 + $0x40] sm:$0xff] }
 0x3fa   :  { %v1170_v48 = vunpack.c.l.bf16 %v1145_v47  ;;  %v1171_v49 = vunpack.c.h.bf16 %v1145_v47 }
 0x3fd   :  { %v2080_v56 = vpop.eup %2079 }
 0x3fe   :  { %v988_v57 = vmul.f32 0.6931472, %v2080_v56  ;;  %v1142_v56 = vld [vmem:[#allocation14 + $0x30] sm:$0xff] }
 0x3ff   :  { %v1164_v14 = vunpack.c.l.bf16 %v1142_v56  ;;  %v1165_v21 = vunpack.c.h.bf16 %v1142_v56 }
 0x400   :  { %v994_v61 = vsel %vm993_vm10, %v991_v60, %v988_v57  ;;  %v1168_v57 = vunpack.c.l.bf16 %v1144_v52  ;;  %v1169_v60 = vunpack.c.h.bf16 %v1144_v52 }
 0x401   :  { %v995_v7 = vsel %vm982_vm11, %v980_v40, %v994_v61  ;;  %v1146_v40 = vld [vmem:[#allocation14 + $0x50] sm:$0xff]  ;;  %v1166_v61 = vunpack.c.l.bf16 %v1143_v53 }
 0x402   :  { %1048 = vmatmul.f32.vlgmr.msrb.gmra.mxu2 %v995_v7  ;;  %v1172_v43 = vunpack.c.l.bf16 %v1146_v40  ;;  %v1173_v44 = vunpack.c.h.bf16 %v1146_v40  ;;  %v1167_v7 = vunpack.c.h.bf16 %v1143_v53 }
 0x404   :  { %1195 = vmatpush.msra.mxu0 %v1172_v43  ;;  %1215 = vmatpush.msra.mxu1 %v1173_v44 }
 0x406   :  { %1196 = vmatpush.msra.mxu0 %v1170_v48  ;;  %1216 = vmatpush.msra.mxu1 %v1171_v49 }
 0x408   :  { %1197 = vmatpush.msra.mxu0 %v1168_v57  ;;  %1217 = vmatpush.msra.mxu1 %v1169_v60 }
 0x40a   :  { %1198 = vmatpush.msra.mxu0 %v1166_v61  ;;  %1218 = vmatpush.msra.mxu1 %v1167_v7 }
 0x40c   :  { %1199 = vmatpush.msra.mxu0 %v1164_v14  ;;  %1219 = vmatpush.msra.mxu1 %v1165_v21 }
 0x40e   :  { %1200 = vmatpush.msra.mxu0 %v1162_v18  ;;  %1220 = vmatpush.msra.mxu1 %v1163_v25 }
 0x410   :  { %1201 = vmatpush.msra.mxu0 %v1160_v31  ;;  %1221 = vmatpush.msra.mxu1 %v1161_v30 }
 0x412   :  { %1202 = vmatpush.msra.mxu0 %v1158_v32  ;;  %1222 = vmatpush.msra.mxu1 %v1159_v42 }
 0x414   :  { %1203 = vmatpush.msra.mxu0 %v1156_v46  ;;  %1223 = vmatpush.msra.mxu1 %v1157_v54 }
 0x416   :  { %1204 = vmatpush.msra.mxu0 %v1154_v62  ;;  %1224 = vmatpush.msra.mxu1 %v1155_v63 }
 0x418   :  { %1205 = vmatpush.msra.mxu0 %v1152_v19  ;;  %1225 = vmatpush.msra.mxu1 %v1153_v41 }
 0x485   :  { %v1049_v15 = vpop.f32.mrf.mxu2 }
 0x486   :  { %v1050_v12 = vadd.f32 %v2055_v11, %v1049_v15 }
 0x488   :  { %v1053_v1 = vmin.f32 %v1050_v12, 20.0  ;;  %vm1052_vm13 = vcmp.gt.f32.partialorder %v1050_v12, 20.0 }
 0x48a   :  { %v1054_v16 = vmul.f32 1.442695, %v1053_v1 }
 0x48c   :  { %2081 = vpow2.f32 %v1054_v16 }
 0x492   :  { %v2082_v17 = vpop.eup %2081 }
 0x493   :  { %v1056_v22 = vadd.f32 1.0, %v2082_v17  ;;  %v1059_v23 = vmul.f32 -0.5, %v2082_v17  ;;  %v1062_v24 = vand.u32 2147483647, %v2082_v17 }
 0x495   :  { %2083 = vlog2.f32 %v1056_v22  ;;  %v1060_v13 = vadd.f32 1.0, %v1059_v23  ;;  %vm1063_vm12 = vcmp.lt.f32.partialorder %v1062_v24, 0.0004427343 }
 0x497   :  { %v1061_v29 = vmul.f32 %v2082_v17, %v1060_v13  ;;  %v1184_v13 = vld [vmem:[%s2852_s4 + $0x9] sm:$0x3] }
 0x498   :  { %v1186_v24 = vperm.slane %v1184_v13, 0 }
 0x49b   :  { %v2084_v27 = vpop.eup %2083 }
 0x49c   :  { %v1058_v28 = vmul.f32 0.6931472, %v2084_v27  ;;  %v1187_v27 = vperm.slane %v1184_v13, 1 }
 0x49e   :  { %v1064_v2 = vsel %vm1063_vm12, %v1061_v29, %v1058_v28 }
 0x49f   :  { %v1065_v0 = vsel %vm1052_vm13, %v1050_v12, %v1064_v2 }
 0x4a0   :  { %1118 = vmatmul.f32.vlgmr.msrb.gmra.mxu3 %v1065_v0 }
 0x523   :  { %v1119_v6 = vpop.f32.mrf.mxu3 }
 0x524   :  { %v1120_v20 = vadd.f32 %v2056_v4, %v1119_v6 }
 0x526   :  { %v1123_v50 = vmin.f32 %v1120_v20, 20.0  ;;  %vm1122_vm15 = vcmp.gt.f32.partialorder %v1120_v20, 20.0 }
 0x528   :  { %v1124_v5 = vmul.f32 1.442695, %v1123_v50 }
 0x52a   :  { %2085 = vpow2.f32 %v1124_v5 }
 0x530   :  { %v2086_v10 = vpop.eup %2085 }
 0x531   :  { %v1126_v51 = vadd.f32 1.0, %v2086_v10  ;;  %v1129_v11 = vmul.f32 -0.5, %v2086_v10  ;;  %v1132_v12 = vand.u32 2147483647, %v2086_v10 }
 0x533   :  { %2087 = vlog2.f32 %v1126_v51  ;;  %v1130_v15 = vadd.f32 1.0, %v1129_v11  ;;  %vm1133_vm14 = vcmp.lt.f32.partialorder %v1132_v12, 0.0004427343 }
 0x535   :  { %v1131_v17 = vmul.f32 %v2086_v10, %v1130_v15 }
 0x539   :  { %v2088_v1 = vpop.eup %2087 }
 0x53a   :  { %v1128_v16 = vmul.f32 0.6931472, %v2088_v1 }
 0x53c   :  { %v1134_v22 = vsel %vm1133_vm14, %v1131_v17, %v1128_v16 }
 0x53d   :  { %v1135_v23 = vsel %vm1122_vm15, %v1120_v20, %v1134_v22 }
 0x53e   :  { %1206 = vmatmul.f32.vlgmr.msra.gmra.mxu0 %v1135_v23  ;;  %1226 = vmatmul.f32.vlgmr.msra.gmra.mxu1 %v1135_v23 }
 0x5bb   :  { %v1207_v28 = vpop.f32.mrf.mxu0  ;;  %v1227_v29 = vpop.f32.mrf.mxu1 }
 0x5bc   :  { %v1208_v2 = vadd.f32 %v1207_v28, %v1186_v24  ;;  %v1228_v0 = vadd.f32 %v1227_v29, %v1187_v27 }
 0x5be   :  { %v1232_v3 = vmin.f32 %v1208_v2, 20.0  ;;  %v1233_v9 = vmin.f32 %v1228_v0, 20.0  ;;  %vm1230_vm1 = vcmp.gt.f32.partialorder %v1208_v2, 20.0  ;;  %vm1231_vm3 = vcmp.gt.f32.partialorder %v1228_v0, 20.0 }
 0x5c0   :  { %v1234_v37 = vmul.f32 1.442695, %v1232_v3  ;;  %v1236_v33 = vmul.f32 1.442695, %v1233_v9 }
 0x5c2   :  { %2089 = vpow2.f32 %v1234_v37 }
 0x5c3   :  { %2091 = vpow2.f32 %v1236_v33 }
 0x5c8   :  { %v2090_v34 = vpop.eup %2089 }
 0x5c9   :  { %v2092_v35 = vpop.eup %2091  ;;  %v1238_v38 = vadd.f32 1.0, %v2090_v34  ;;  %v1241_v59 = vmul.f32 -0.5, %v2090_v34  ;;  %v1244_v44 = vand.u32 2147483647, %v2090_v34 }
 0x5ca   :  { %v1247_v39 = vadd.f32 1.0, %v2092_v35  ;;  %v1250_v40 = vmul.f32 -0.5, %v2092_v35  ;;  %v1253_v48 = vand.u32 2147483647, %v2092_v35 }
 0x5cb   :  { %2093 = vlog2.f32 %v1238_v38  ;;  %v1242_v43 = vadd.f32 1.0, %v1241_v59  ;;  %vm1245_vm0 = vcmp.lt.f32.partialorder %v1244_v44, 0.0004427343 }
 0x5cc   :  { %2095 = vlog2.f32 %v1247_v39  ;;  %v1251_v47 = vadd.f32 1.0, %v1250_v40  ;;  %vm1254_vm2 = vcmp.lt.f32.partialorder %v1253_v48, 0.0004427343 }
 0x5cd   :  { %v1243_v56 = vmul.f32 %v2090_v34, %v1242_v43 }
 0x5ce   :  { %v1252_v60 = vmul.f32 %v2092_v35, %v1251_v47 }
 0x5d1   :  { %v2094_v49 = vpop.eup %2093 }
 0x5d2   :  { %v2096_v52 = vpop.eup %2095  ;;  %v1240_v53 = vmul.f32 0.6931472, %v2094_v49 }
 0x5d3   :  { %v1249_v57 = vmul.f32 0.6931472, %v2096_v52 }
 0x5d4   :  { %v1246_v61 = vsel %vm1245_vm0, %v1243_v56, %v1240_v53 }
 0x5d5   :  { %v2814_v7 = vsel %vm1230_vm1, %v1208_v2, %v1246_v61  ;;  %v1255_v8 = vsel %vm1254_vm2, %v1252_v60, %v1249_v57 }
 0x5d6   :  { %v2816_v14 = vsel %vm1231_vm3, %v1228_v0, %v1255_v8 }
 0x5d7   :  { %s1265_s29 = sshll.u32 %s2850_s2, 4  ;;  %s2370_s5 = smov [#allocation25]   ;;  %s1266_s29 = int_to_ptr.hbm [resolvable:$true] %s1265_s29 }
 0x5d8   :  { %s1267_s30 = sshll.u32 %s2370_s5, 4  ;;  %s1268_s30 = int_to_ptr.vmem [resolvable:$true] %s1267_s30 }
 0x5d9   :  { %1270 = dma.hbm_to_vmem [thread:$0]  %s1266_s29, 8192, %s1268_s30, [#allocation28] }
 0x5da   :  { %2351 = dma.done.wait [#allocation28], 8192 }
 0x5db   :  { %2352 = vsyncadd [#allocation28], 4294959104 }
 0x5dc   :  { %v1289_v21 = vld [vmem:[%s2851_s3] sm:$0xf] }
 0x5dd   :  { %1290 = vst [vmem:[#allocation26] sm:$0xf] %v1289_v21 }
 0x5de   :  { %1308 = vsyncadd [#allocation31], 64 }
 0x5df   :  { %2353 = dma.done.wait [#allocation31], 64 }
 0x5e0   :  { %2354 = vsyncadd [#allocation31], 4294967232  ;;  %v1342_v58 = vld [vmem:[#allocation25 + $0xf0] sm:$0xff]  ;;  %v1340_v18 = vld [vmem:[#allocation25 + $0xe0] sm:$0xff] }
 0x5e1   :  { %v1374_v25 = vld [vmem:[#allocation25 + $0x1f0] sm:$0xff]  ;;  %v1436_v26 = vunpack.c.l.bf16 %v1342_v58  ;;  %v1432_v31 = vunpack.c.l.bf16 %v1340_v18  ;;  %v1372_v32 = vld [vmem:[#allocation25 + $0x1e0] sm:$0xff]  ;;  %v1437_v42 = vunpack.c.h.bf16 %v1342_v58  ;;  %v1433_v62 = vunpack.c.h.bf16 %v1340_v18 }
 0x5e2   :  { %v1500_v30 = vunpack.c.l.bf16 %v1374_v25  ;;  %v1338_v36 = vld [vmem:[#allocation25 + $0xd0] sm:$0xff]  ;;  %v1496_v45 = vunpack.c.l.bf16 %v1372_v32  ;;  %v1336_v46 = vld [vmem:[#allocation25 + $0xc0] sm:$0xff]  ;;  %v1501_v41 = vunpack.c.h.bf16 %v1374_v25  ;;  %v1497_v50 = vunpack.c.h.bf16 %v1372_v32 }
 0x5e3   :  { %v1370_v54 = vld [vmem:[#allocation25 + $0x1d0] sm:$0xff]  ;;  %v1368_v55 = vld [vmem:[#allocation25 + $0x1c0] sm:$0xff]  ;;  %1514 = vmatpush.msra.mxu2 %v1436_v26  ;;  %v1428_v63 = vunpack.c.l.bf16 %v1338_v36  ;;  %1554 = vmatpush.msrb.mxu0 %v1437_v42  ;;  %v1429_v20 = vunpack.c.h.bf16 %v1338_v36  ;;  %v1424_v5 = vunpack.c.l.bf16 %v1336_v46  ;;  %v1425_v15 = vunpack.c.h.bf16 %v1336_v46 }
 0x5e4   :  { %1534 = vmatpush.msra.mxu3 %v1500_v30  ;;  %v1492_v19 = vunpack.c.l.bf16 %v1370_v54  ;;  %v1334_v4 = vld [vmem:[#allocation25 + $0xb0] sm:$0xff]  ;;  %v1488_v10 = vunpack.c.l.bf16 %v1368_v55  ;;  %1574 = vmatpush.msrb.mxu1 %v1501_v41  ;;  %v1332_v51 = vld [vmem:[#allocation25 + $0xa0] sm:$0xff]  ;;  %v1493_v12 = vunpack.c.h.bf16 %v1370_v54  ;;  %v1489_v13 = vunpack.c.h.bf16 %v1368_v55 }
 0x5e5   :  { %v1366_v6 = vld [vmem:[#allocation25 + $0x1b0] sm:$0xff]  ;;  %1515 = vmatpush.msra.mxu2 %v1432_v31  ;;  %1555 = vmatpush.msrb.mxu0 %v1433_v62  ;;  %v1364_v11 = vld [vmem:[#allocation25 + $0x1a0] sm:$0xff]  ;;  %v1420_v1 = vunpack.c.l.bf16 %v1334_v4  ;;  %v1421_v23 = vunpack.c.h.bf16 %v1334_v4  ;;  %v1416_v24 = vunpack.c.l.bf16 %v1332_v51  ;;  %v1417_v2 = vunpack.c.h.bf16 %v1332_v51 }
 0x5e6   :  { %1535 = vmatpush.msra.mxu3 %v1496_v45  ;;  %v1484_v16 = vunpack.c.l.bf16 %v1366_v6  ;;  %1575 = vmatpush.msrb.mxu1 %v1497_v50  ;;  %v1330_v17 = vld [vmem:[#allocation25 + $0x90] sm:$0xff]  ;;  %v1480_v27 = vunpack.c.l.bf16 %v1364_v11  ;;  %v1328_v28 = vld [vmem:[#allocation25 + $0x80] sm:$0xff]  ;;  %v1485_v0 = vunpack.c.h.bf16 %v1366_v6  ;;  %v1481_v35 = vunpack.c.h.bf16 %v1364_v11 }
 0x5e7   :  { %1516 = vmatpush.msra.mxu2 %v1428_v63  ;;  %1556 = vmatpush.msrb.mxu0 %v1429_v20  ;;  %v1362_v22 = vld [vmem:[#allocation25 + $0x190] sm:$0xff]  ;;  %v1360_v29 = vld [vmem:[#allocation25 + $0x180] sm:$0xff]  ;;  %v1412_v3 = vunpack.c.l.bf16 %v1330_v17  ;;  %v1413_v34 = vunpack.c.h.bf16 %v1330_v17  ;;  %v1408_v38 = vunpack.c.l.bf16 %v1328_v28  ;;  %v1409_v43 = vunpack.c.h.bf16 %v1328_v28 }
 0x5e8   :  { %1536 = vmatpush.msra.mxu3 %v1492_v19  ;;  %1576 = vmatpush.msrb.mxu1 %v1493_v12  ;;  %v1476_v9 = vunpack.c.l.bf16 %v1362_v22  ;;  %v1326_v37 = vld [vmem:[#allocation25 + $0x70] sm:$0xff]  ;;  %v1472_v59 = vunpack.c.l.bf16 %v1360_v29  ;;  %v1324_v39 = vld [vmem:[#allocation25 + $0x60] sm:$0xff]  ;;  %v1477_v44 = vunpack.c.h.bf16 %v1362_v22  ;;  %v1473_v56 = vunpack.c.h.bf16 %v1360_v29 }
 0x5e9   :  { %1517 = vmatpush.msra.mxu2 %v1424_v5  ;;  %1557 = vmatpush.msrb.mxu0 %v1425_v15  ;;  %v1358_v33 = vld [vmem:[#allocation25 + $0x170] sm:$0xff]  ;;  %v1356_v40 = vld [vmem:[#allocation25 + $0x160] sm:$0xff]  ;;  %v1404_v47 = vunpack.c.l.bf16 %v1326_v37  ;;  %v1405_v53 = vunpack.c.h.bf16 %v1326_v37  ;;  %v1400_v57 = vunpack.c.l.bf16 %v1324_v39  ;;  %v1401_v21 = vunpack.c.h.bf16 %v1324_v39 }
 0x5ea   :  { %1537 = vmatpush.msra.mxu3 %v1488_v10  ;;  %1577 = vmatpush.msrb.mxu1 %v1489_v13  ;;  %v1468_v48 = vunpack.c.l.bf16 %v1358_v33  ;;  %v1322_v49 = vld [vmem:[#allocation25 + $0x50] sm:$0xff]  ;;  %v1464_v60 = vunpack.c.l.bf16 %v1356_v40  ;;  %v1320_v61 = vld [vmem:[#allocation25 + $0x40] sm:$0xff]  ;;  %v1469_v58 = vunpack.c.h.bf16 %v1358_v33  ;;  %v1465_v36 = vunpack.c.h.bf16 %v1356_v40 }
 0x5eb   :  { %1518 = vmatpush.msra.mxu2 %v1420_v1  ;;  %1558 = vmatpush.msrb.mxu0 %v1421_v23  ;;  %v1354_v52 = vld [vmem:[#allocation25 + $0x150] sm:$0xff]  ;;  %v1352_v8 = vld [vmem:[#allocation25 + $0x140] sm:$0xff]  ;;  %v1396_v18 = vunpack.c.l.bf16 %v1322_v49  ;;  %v1397_v30 = vunpack.c.h.bf16 %v1322_v49  ;;  %v1392_v32 = vunpack.c.l.bf16 %v1320_v61  ;;  %v1393_v54 = vunpack.c.h.bf16 %v1320_v61  ;;  %v1343_v1 = vld [vmem:[#allocation25 + $0xf8] sm:$0xff] }
 0x5ec   :  { %1538 = vmatpush.msra.mxu3 %v1484_v16  ;;  %1578 = vmatpush.msrb.mxu1 %v1485_v0  ;;  %v1460_v25 = vunpack.c.l.bf16 %v1354_v52  ;;  %v1318_v26 = vld [vmem:[#allocation25 + $0x30] sm:$0xff]  ;;  %v1456_v42 = vunpack.c.l.bf16 %v1352_v8  ;;  %v1316_v45 = vld [vmem:[#allocation25 + $0x20] sm:$0xff]  ;;  %v1461_v55 = vunpack.c.h.bf16 %v1354_v52  ;;  %v1457_v6 = vunpack.c.h.bf16 %v1352_v8  ;;  %v1375_v16 = vld [vmem:[#allocation25 + $0x1f8] sm:$0xff] }
 0x5ed   :  { %1519 = vmatpush.msra.mxu2 %v1416_v24  ;;  %1559 = vmatpush.msrb.mxu0 %v1417_v2  ;;  %v1350_v31 = vld [vmem:[#allocation25 + $0x130] sm:$0xff]  ;;  %v1348_v46 = vld [vmem:[#allocation25 + $0x120] sm:$0xff]  ;;  %v1388_v62 = vunpack.c.l.bf16 %v1318_v26  ;;  %v1389_v4 = vunpack.c.h.bf16 %v1318_v26  ;;  %v1384_v20 = vunpack.c.l.bf16 %v1316_v45  ;;  %v1385_v51 = vunpack.c.h.bf16 %v1316_v45  ;;  %v1341_v24 = vld [vmem:[#allocation25 + $0xe8] sm:$0xff] }
 0x5ee   :  { %1539 = vmatpush.msra.mxu3 %v1480_v27  ;;  %1579 = vmatpush.msrb.mxu1 %v1481_v35  ;;  %v1452_v63 = vunpack.c.l.bf16 %v1350_v31  ;;  %v1314_v19 = vld [vmem:[#allocation25 + $0x10] sm:$0xff]  ;;  %v1448_v50 = vunpack.c.l.bf16 %v1348_v46  ;;  %v1312_v5 = vld [vmem:[#allocation25] sm:$0xff]  ;;  %v1453_v11 = vunpack.c.h.bf16 %v1350_v31  ;;  %v1449_v22 = vunpack.c.h.bf16 %v1348_v46  ;;  %v1373_v27 = vld [vmem:[#allocation25 + $0x1e8] sm:$0xff] }
 0x5ef   :  { %1520 = vmatpush.msra.mxu2 %v1412_v3  ;;  %1560 = vmatpush.msrb.mxu0 %v1413_v34  ;;  %v1346_v41 = vld [vmem:[#allocation25 + $0x110] sm:$0xff]  ;;  %v1344_v10 = vld [vmem:[#allocation25 + $0x100] sm:$0xff]  ;;  %v1380_v15 = vunpack.c.l.bf16 %v1314_v19  ;;  %v1381_v17 = vunpack.c.h.bf16 %v1314_v19  ;;  %v1376_v23 = vunpack.c.l.bf16 %v1312_v5  ;;  %v1438_v28 = vunpack.c.l.bf16 %v1343_v1  ;;  %v1339_v2 = vld [vmem:[#allocation25 + $0xd8] sm:$0xff] }
 0x5f0   :  { %1540 = vmatpush.msra.mxu3 %v1476_v9  ;;  %1580 = vmatpush.msrb.mxu1 %v1477_v44  ;;  %v1444_v12 = vunpack.c.l.bf16 %v1346_v41  ;;  %v1440_v13 = vunpack.c.l.bf16 %v1344_v10  ;;  %v1502_v29 = vunpack.c.l.bf16 %v1375_v16  ;;  %v1377_v0 = vunpack.c.h.bf16 %v1312_v5  ;;  %v1371_v9 = vld [vmem:[#allocation25 + $0x1d8] sm:$0xff]  ;;  %v1337_v34 = vld [vmem:[#allocation25 + $0xc8] sm:$0xff] }
 0x5f1   :  { %1521 = vmatpush.msra.mxu2 %v1408_v38  ;;  %1561 = vmatpush.msrb.mxu0 %v1409_v43  ;;  %v1445_v3 = vunpack.c.h.bf16 %v1346_v41  ;;  %v1434_v37 = vunpack.c.l.bf16 %v1341_v24  ;;  %v1498_v33 = vunpack.c.l.bf16 %v1373_v27  ;;  %v1439_v35 = vunpack.c.h.bf16 %v1343_v1  ;;  %v1335_v43 = vld [vmem:[#allocation25 + $0xb8] sm:$0xff] }
 0x5f2   :  { %1541 = vmatpush.msra.mxu3 %v1472_v59  ;;  %1581 = vmatpush.msrb.mxu1 %v1473_v56  ;;  %v1441_v38 = vunpack.c.h.bf16 %v1344_v10  ;;  %v1369_v59 = vld [vmem:[#allocation25 + $0x1c8] sm:$0xff]  ;;  %v1430_v39 = vunpack.c.l.bf16 %v1339_v2  ;;  %v1494_v40 = vunpack.c.l.bf16 %v1371_v9  ;;  %v1435_v44 = vunpack.c.h.bf16 %v1341_v24 }
 0x5f3   :  { %1522 = vmatpush.msra.mxu2 %v1404_v47  ;;  %1562 = vmatpush.msrb.mxu0 %v1405_v53  ;;  %v1503_v47 = vunpack.c.h.bf16 %v1375_v16  ;;  %v1426_v49 = vunpack.c.l.bf16 %v1337_v34  ;;  %v1490_v52 = vunpack.c.l.bf16 %v1369_v59  ;;  %v1333_v53 = vld [vmem:[#allocation25 + $0xa8] sm:$0xff]  ;;  %v1431_v56 = vunpack.c.h.bf16 %v1339_v2  ;;  %v1351_v2 = vld [vmem:[#allocation25 + $0x138] sm:$0xff] }
 0x5f4   :  { %1542 = vmatpush.msra.mxu3 %v1468_v48  ;;  %1582 = vmatpush.msrb.mxu1 %v1469_v58  ;;  %v1367_v48 = vld [vmem:[#allocation25 + $0x1b8] sm:$0xff]  ;;  %v1422_v61 = vunpack.c.l.bf16 %v1335_v43  ;;  %v1427_v58 = vunpack.c.h.bf16 %v1337_v34  ;;  %v1418_v26 = vunpack.c.l.bf16 %v1333_v53 }
 0x5f5   :  { %1523 = vmatpush.msra.mxu2 %v1400_v57  ;;  %1563 = vmatpush.msrb.mxu0 %v1401_v21  ;;  %v1499_v57 = vunpack.c.h.bf16 %v1373_v27  ;;  %v1486_v8 = vunpack.c.l.bf16 %v1367_v48  ;;  %v1331_v21 = vld [vmem:[#allocation25 + $0x98] sm:$0xff] }
 0x5f6   :  { %1543 = vmatpush.msra.mxu3 %v1464_v60  ;;  %1583 = vmatpush.msrb.mxu1 %v1465_v36  ;;  %v1365_v60 = vld [vmem:[#allocation25 + $0x1a8] sm:$0xff]  ;;  %v1423_v36 = vunpack.c.h.bf16 %v1335_v43  ;;  %v1414_v45 = vunpack.c.l.bf16 %v1331_v21 }
 0x5f7   :  { %1524 = vmatpush.msra.mxu2 %v1396_v18  ;;  %1564 = vmatpush.msrb.mxu0 %v1397_v30  ;;  %v1495_v18 = vunpack.c.h.bf16 %v1371_v9  ;;  %v1482_v31 = vunpack.c.l.bf16 %v1365_v60  ;;  %v1329_v30 = vld [vmem:[#allocation25 + $0x88] sm:$0xff] }
 0x5f8   :  { %1544 = vmatpush.msra.mxu3 %v1460_v25  ;;  %1584 = vmatpush.msrb.mxu1 %v1461_v55  ;;  %v1363_v25 = vld [vmem:[#allocation25 + $0x198] sm:$0xff]  ;;  %v1419_v55 = vunpack.c.h.bf16 %v1333_v53  ;;  %v1410_v19 = vunpack.c.l.bf16 %v1329_v30 }
 0x5f9   :  { %1525 = vmatpush.msra.mxu2 %v1392_v32  ;;  %1565 = vmatpush.msrb.mxu0 %v1393_v54  ;;  %v1491_v32 = vunpack.c.h.bf16 %v1369_v59  ;;  %v1478_v46 = vunpack.c.l.bf16 %v1363_v25  ;;  %v1327_v54 = vld [vmem:[#allocation25 + $0x78] sm:$0xff] }
 0x5fa   :  { %1545 = vmatpush.msra.mxu3 %v1456_v42  ;;  %1585 = vmatpush.msrb.mxu1 %v1457_v6  ;;  %v1361_v42 = vld [vmem:[#allocation25 + $0x188] sm:$0xff]  ;;  %v1415_v6 = vunpack.c.h.bf16 %v1331_v21  ;;  %v1406_v5 = vunpack.c.l.bf16 %v1327_v54 }
 0x5fb   :  { %1526 = vmatpush.msra.mxu2 %v1388_v62  ;;  %1566 = vmatpush.msrb.mxu0 %v1389_v4  ;;  %v1487_v62 = vunpack.c.h.bf16 %v1367_v48  ;;  %v1474_v41 = vunpack.c.l.bf16 %v1361_v42  ;;  %v1325_v4 = vld [vmem:[#allocation25 + $0x68] sm:$0xff] }
 0x5fc   :  { %1546 = vmatpush.msra.mxu3 %v1452_v63  ;;  %1586 = vmatpush.msrb.mxu1 %v1453_v11  ;;  %v2824_v63 = vld [vmem:[#allocation25 + $0x178] sm:$0xff]  ;;  %v1411_v11 = vunpack.c.h.bf16 %v1329_v30  ;;  %v1402_v1 = vunpack.c.l.bf16 %v1325_v4 }
 0x5fd   :  { %1527 = vmatpush.msra.mxu2 %v1384_v20  ;;  %1567 = vmatpush.msrb.mxu0 %v1385_v51  ;;  %v1483_v20 = vunpack.c.h.bf16 %v1365_v60  ;;  %v1470_v10 = vunpack.c.l.bf16 %v2824_v63  ;;  %v1323_v51 = vld [vmem:[#allocation25 + $0x58] sm:$0xff]  ;;  %v1471_v9 = vunpack.c.h.bf16 %v2824_v63 }
 0x5fe   :  { %1547 = vmatpush.msra.mxu3 %v1448_v50  ;;  %1587 = vmatpush.msrb.mxu1 %v1449_v22  ;;  %v1357_v50 = vld [vmem:[#allocation25 + $0x168] sm:$0xff]  ;;  %v1407_v22 = vunpack.c.h.bf16 %v1327_v54  ;;  %v1398_v24 = vunpack.c.l.bf16 %v1323_v51 }
 0x5ff   :  { %1528 = vmatpush.msra.mxu2 %v1380_v15  ;;  %1568 = vmatpush.msrb.mxu0 %v1381_v17  ;;  %v1479_v15 = vunpack.c.h.bf16 %v1363_v25  ;;  %v1466_v16 = vunpack.c.l.bf16 %v1357_v50  ;;  %v1321_v17 = vld [vmem:[#allocation25 + $0x48] sm:$0xff]  ;;  %v1467_v59 = vunpack.c.h.bf16 %v1357_v50 }
 0x600   :  { %1548 = vmatpush.msra.mxu3 %v1444_v12  ;;  %1588 = vmatpush.msrb.mxu1 %v1445_v3  ;;  %v1355_v12 = vld [vmem:[#allocation25 + $0x158] sm:$0xff] }
 0x601   :  { %1529 = vmatpush.msra.mxu2 %v1376_v23  ;;  %1569 = vmatpush.msrb.mxu0 %v1377_v0  ;;  %v1475_v23 = vunpack.c.h.bf16 %v1361_v42  ;;  %v1462_v27 = vunpack.c.l.bf16 %v1355_v12  ;;  %v1394_v0 = vunpack.c.l.bf16 %v1321_v17  ;;  %v1463_v48 = vunpack.c.h.bf16 %v1355_v12 }
 0x602   :  { %1549 = vmatpush.msra.mxu3 %v1440_v13  ;;  %1589 = vmatpush.msrb.mxu1 %v1441_v38  ;;  %v1353_v13 = vld [vmem:[#allocation25 + $0x148] sm:$0xff]  ;;  %v1399_v38 = vunpack.c.h.bf16 %v1323_v51 }
 0x603   :  { %1594 = vmatpush.msrb.mxu2 %v1438_v28  ;;  %1634 = vmatpush.msra.mxu0 %v1439_v35  ;;  %v1319_v28 = vld [vmem:[#allocation25 + $0x38] sm:$0xff]  ;;  %v1458_v3 = vunpack.c.l.bf16 %v1353_v13  ;;  %v1454_v35 = vunpack.c.l.bf16 %v1351_v2 }
 0x604   :  { %1614 = vmatpush.msrb.mxu3 %v1502_v29  ;;  %1654 = vmatpush.msra.mxu1 %v1503_v47  ;;  %v1403_v29 = vunpack.c.h.bf16 %v1325_v4  ;;  %v1390_v34 = vunpack.c.l.bf16 %v1319_v28  ;;  %v1395_v47 = vunpack.c.h.bf16 %v1321_v17 }
 0x605   :  { %1595 = vmatpush.msrb.mxu2 %v1434_v37  ;;  %1635 = vmatpush.msra.mxu0 %v1435_v44  ;;  %v1317_v37 = vld [vmem:[#allocation25 + $0x28] sm:$0xff]  ;;  %v1347_v44 = vld [vmem:[#allocation25 + $0x118] sm:$0xff] }
 0x606   :  { %1615 = vmatpush.msrb.mxu3 %v1498_v33  ;;  %1655 = vmatpush.msra.mxu1 %v1499_v57  ;;  %v1349_v33 = vld [vmem:[#allocation25 + $0x128] sm:$0xff]  ;;  %v1446_v53 = vunpack.c.l.bf16 %v1347_v44  ;;  %v1387_v21 = vunpack.c.h.bf16 %v1317_v37 }
 0x607   :  { %1596 = vmatpush.msrb.mxu2 %v1430_v39  ;;  %1636 = vmatpush.msra.mxu0 %v1431_v56  ;;  %v1315_v39 = vld [vmem:[#allocation25 + $0x18] sm:$0xff]  ;;  %v1450_v43 = vunpack.c.l.bf16 %v1349_v33  ;;  %v1391_v56 = vunpack.c.h.bf16 %v1319_v28  ;;  %v1345_v57 = vld [vmem:[#allocation25 + $0x108] sm:$0xff]  ;;  %v1451_v25 = vunpack.c.h.bf16 %v1349_v33 }
 0x608   :  { %1616 = vmatpush.msrb.mxu3 %v1494_v40  ;;  %1656 = vmatpush.msra.mxu1 %v1495_v18  ;;  %v1386_v40 = vunpack.c.l.bf16 %v1317_v37  ;;  %v1383_v18 = vunpack.c.h.bf16 %v1315_v39  ;;  %v1443_v30 = vunpack.c.h.bf16 %v1345_v57 }
 0x609   :  { %1597 = vmatpush.msrb.mxu2 %v1426_v49  ;;  %1637 = vmatpush.msra.mxu0 %v1427_v58  ;;  %v1313_v49 = vld [vmem:[#allocation25 + $0x8] sm:$0xff]  ;;  %v1455_v58 = vunpack.c.h.bf16 %v1351_v2 }
 0x60a   :  { %1617 = vmatpush.msrb.mxu3 %v1490_v52  ;;  %1657 = vmatpush.msra.mxu1 %v1491_v32  ;;  %v1382_v52 = vunpack.c.l.bf16 %v1315_v39  ;;  %v1378_v60 = vunpack.c.l.bf16 %v1313_v49 }
 0x60b   :  { %1598 = vmatpush.msrb.mxu2 %v1422_v61  ;;  %1638 = vmatpush.msra.mxu0 %v1423_v36  ;;  %v1459_v61 = vunpack.c.h.bf16 %v1353_v13  ;;  %v1504_v36 = vld [vmem:[#allocation26] sm:$0xf] }
 0x60c   :  { %1618 = vmatpush.msrb.mxu3 %v1486_v8  ;;  %1658 = vmatpush.msra.mxu1 %v1487_v62  ;;  %v1442_v8 = vunpack.c.l.bf16 %v1345_v57  ;;  %v1506_v32 = vperm.slane %v1504_v36, 0  ;;  %v1507_v42 = vperm.slane %v1504_v36, 1  ;;  %v1508_v4 = vperm.slane %v1504_v36, 2 }
 0x60d   :  { %1599 = vmatpush.msrb.mxu2 %v1418_v26  ;;  %1639 = vmatpush.msra.mxu0 %v1419_v55  ;;  %v1379_v26 = vunpack.c.h.bf16 %v1313_v49 }
 0x60e   :  { %1619 = vmatpush.msrb.mxu3 %v1482_v31  ;;  %1659 = vmatpush.msra.mxu1 %v1483_v20  ;;  %v1447_v31 = vunpack.c.h.bf16 %v1347_v44 }
 0x60f   :  { %1600 = vmatpush.msrb.mxu2 %v1414_v45  ;;  %1640 = vmatpush.msra.mxu0 %v1415_v6  ;;  %v1509_v6 = vperm.slane %v1504_v36, 3 }
 0x610   :  { %1620 = vmatpush.msrb.mxu3 %v1478_v46  ;;  %1660 = vmatpush.msra.mxu1 %v1479_v15 }
 0x611   :  { %1601 = vmatpush.msrb.mxu2 %v1410_v19  ;;  %1641 = vmatpush.msra.mxu0 %v1411_v11 }
 0x612   :  { %1621 = vmatpush.msrb.mxu3 %v1474_v41  ;;  %1661 = vmatpush.msra.mxu1 %v1475_v23 }
 0x613   :  { %1602 = vmatpush.msrb.mxu2 %v1406_v5  ;;  %1642 = vmatpush.msra.mxu0 %v1407_v22 }
 0x614   :  { %1622 = vmatpush.msrb.mxu3 %v1470_v10  ;;  %1530 = vmatmul.f32.vlgmr.msra.gmra.mxu2 %v2814_v7 }
 0x615   :  { %1603 = vmatpush.msrb.mxu2 %v1402_v1  ;;  %1643 = vmatpush.msra.mxu0 %v1403_v29 }
 0x616   :  { %1623 = vmatpush.msrb.mxu3 %v1466_v16  ;;  %1662 = vmatpush.msra.mxu1 %v1471_v9 }
 0x617   :  { %1604 = vmatpush.msrb.mxu2 %v1398_v24  ;;  %1550 = vmatmul.f32.vlgmr.msra.gmra.mxu3 %v2816_v14 }
 0x618   :  { %1624 = vmatpush.msrb.mxu3 %v1462_v27  ;;  %1644 = vmatpush.msra.mxu0 %v1399_v38 }
 0x619   :  { %1605 = vmatpush.msrb.mxu2 %v1394_v0  ;;  %1663 = vmatpush.msra.mxu1 %v1467_v59 }
 0x61a   :  { %1625 = vmatpush.msrb.mxu3 %v1458_v3  ;;  %1645 = vmatpush.msra.mxu0 %v1395_v47 }
 0x61b   :  { %1606 = vmatpush.msrb.mxu2 %v1390_v34  ;;  %1664 = vmatpush.msra.mxu1 %v1463_v48 }
 0x61c   :  { %1626 = vmatpush.msrb.mxu3 %v1454_v35  ;;  %1570 = vmatmul.f32.vlgmr.msrb.gmra.mxu0 %v2814_v7 }
 0x61d   :  { %1607 = vmatpush.msrb.mxu2 %v1386_v40  ;;  %1646 = vmatpush.msra.mxu0 %v1391_v56 }
 0x61e   :  { %1627 = vmatpush.msrb.mxu3 %v1450_v43  ;;  %1665 = vmatpush.msra.mxu1 %v1459_v61 }
 0x61f   :  { %1608 = vmatpush.msrb.mxu2 %v1382_v52  ;;  %1590 = vmatmul.f32.vlgmr.msrb.gmra.mxu1 %v2816_v14 }
 0x620   :  { %1628 = vmatpush.msrb.mxu3 %v1446_v53  ;;  %1647 = vmatpush.msra.mxu0 %v1387_v21 }
 0x621   :  { %1609 = vmatpush.msrb.mxu2 %v1378_v60  ;;  %1666 = vmatpush.msra.mxu1 %v1455_v58 }
 0x622   :  { %1610 = vmatmul.f32.vlgmr.msrb.gmra.mxu2 %v2814_v7  ;;  %1629 = vmatpush.msrb.mxu3 %v1442_v8 }
 0x623   :  { %1630 = vmatmul.f32.vlgmr.msrb.gmra.mxu3 %v2816_v14  ;;  %1648 = vmatpush.msra.mxu0 %v1383_v18 }
 0x624   :  { %1667 = vmatpush.msra.mxu1 %v1451_v25 }
 0x625   :  { %1649 = vmatpush.msra.mxu0 %v1379_v26 }
 0x626   :  { %1668 = vmatpush.msra.mxu1 %v1447_v31  ;;  %1650 = vmatmul.f32.vlgmr.msra.gmra.mxu0 %v2814_v7 }
 0x628   :  { %1669 = vmatpush.msra.mxu1 %v1443_v30 }
 0x629   :  { %1670 = vmatmul.f32.vlgmr.msra.gmra.mxu1 %v2816_v14 }
 0x697   :  { %v1531_v45 = vpop.f32.mrf.mxu2 }
 0x698   :  { %v1532_v46 = vadd.f32 %v1531_v45, %v1506_v32 }
 0x699   :  { %v1571_v54 = vpop.f32.mrf.mxu0 }
 0x69a   :  { %v1572_v55 = vadd.f32 %v1571_v54, %v1507_v42  ;;  %v1551_v62 = vpop.f32.mrf.mxu3 }
 0x69b   :  { %v1552_v63 = vadd.f32 %v1551_v62, %v1532_v46 }
 0x69c   :  { %v1591_v19 = vpop.f32.mrf.mxu1 }
 0x69d   :  { %v1592_v41 = vadd.f32 %v1591_v19, %v1572_v55 }
 0x6a3   :  { %v1651_v50 = vpop.f32.mrf.mxu0 }
 0x6a4   :  { %v1652_v7 = vadd.f32 %v1651_v50, %v1509_v6 }
 0x6a5   :  { %v1611_v20 = vpop.f32.mrf.mxu2 }
 0x6a6   :  { %v1612_v5 = vadd.f32 %v1611_v20, %v1508_v4  ;;  %v1631_v10 = vpop.f32.mrf.mxu3  ;;  %v1671_v14 = vpop.f32.mrf.mxu1 }
 0x6a7   :  { %v1672_v11 = vadd.f32 %v1671_v14, %v1652_v7 }
 0x6a8   :  { %v1632_v51 = vadd.f32 %v1631_v10, %v1612_v5 }
 0x6a9   :  { %1689 = vst [vmem:[%s2861_s13] sm:$0xff] %v1552_v63 }
 0x6aa   :  { %1691 = vst [vmem:[%s2861_s13 + $0x8] sm:$0xff] %v1592_v41 }
 0x6ab   :  { %1693 = vst [vmem:[%s2861_s13 + $0x10] sm:$0xff] %v1632_v51 }
 0x6ac   :  { %1695 = vst [vmem:[%s2861_s13 + $0x18] sm:$0xff] %v1672_v11 }
 0x6ad   :  { %1701 = vsyncadd [#allocation33], 512 }
 0x6ae   :  { %2355 = dma.done.wait [#allocation33], 512 }
 0x6af   :  { %2356 = vsyncadd [#allocation33], 4294966784 }
 0x6b0   :  { %1706 = vsyncpa [#allocation4], 1 }
 0x6b1   :  { %1707 = vsyncpa [#allocation6], 1 }
 0x6b2   :  { %1708 = vsyncpa [#allocation9], 1 }
 0x6b3   :  { %1709 = vsyncpa [#allocation12], 1 }
 0x6b4   :  { %1710 = vsyncpa [#allocation15], 1 }

</bundles_post_ra>
